<compile_context>
chip_gen: v6e
topology: v6e:2x2x1
jax: 0.10.0
libtpu: 0.0.40
codegen_flags: <defaults>
</compile_context>

<pallas_src>
import jax
import jax.numpy as jnp
from jax.experimental import pallas as pl
from jax.experimental.pallas import tpu as pltpu

INPUT_DIM = 784
HIDDEN_DIM = 400
LATENT_DIM = 20

# Lane-aligned (multiple-of-128) padded dims for the hidden / latent axes.
HIDDEN_PAD = 512          # 4 * 128
LATENT_PAD = 128          # 1 * 128
ML_PAD = 2 * LATENT_PAD   # fused [mu | logvar] width


def _round_up(x, m):
    return (x + m - 1) // m * m


def _choose_tiling(batch):
    """Return (tm, b_pad).

    Tiny batches -> one 8-row-aligned tile. Otherwise keep >= 2 grid steps
    (so the "parallel" batch axis shards across both TensorCores on v7x),
    cap the tile at 512 rows, and pick the candidate minimizing padded rows
    (ties broken towards fewer, fatter steps).
    """
    rows = _round_up(max(batch, 1), 8)
    if rows <= 16:
        return rows, rows
    half = min(_round_up(-(-rows // 2), 8), 512)
    candidates = {half} | {t for t in (64, 128, 256, 512) if t <= half}
    best_tm, best_key = None, None
    for tm in sorted(candidates):
        b_pad = _round_up(rows, tm)
        key = (b_pad - rows, -tm)   # least padding first, then largest tile
        if best_key is None or key < best_key:
            best_tm, best_key = tm, key
    return best_tm, _round_up(rows, best_tm)


def vae_kernel(x_ref, eps_ref,
               w1_ref, b1_ref,
               wml_ref, bml_ref,
               w3_ref, b3_ref,
               w4_ref, b4_ref,
               recon_ref, ml_ref):
    # ---- encode: h1 = relu(x @ W1 + b1)            (K = 784, unpadded)
    h1 = jnp.dot(x_ref[...], w1_ref[...],
                 preferred_element_type=jnp.float32) + b1_ref[...]
    h1 = jnp.maximum(h1, 0.0)

    # ---- fused latent heads: [mu | logvar] = h1 @ [W21 | W22] + [b21 | b22]
    ml = jnp.dot(h1.astype(jnp.bfloat16), wml_ref[...],
                 preferred_element_type=jnp.float32) + bml_ref[...]
    ml_ref[...] = ml                       # single lane-dense (tm, 256) store
    mu = ml[:, :LATENT_PAD]
    logvar = ml[:, LATENT_PAD:]

    # ---- reparameterize: z = mu + eps * exp(0.5 * logvar)   (f32 elementwise)
    # Padded latent columns: mu=0, logvar=0 -> std=1, but eps padded cols are 0 -> z=0.
    std = jnp.exp(0.5 * logvar)
    z = mu + eps_ref[...] * std

    # ---- decode: recon = sigmoid(relu(z @ W3 + b3) @ W4 + b4)
    h3 = jnp.dot(z.astype(jnp.bfloat16), w3_ref[...],
                 preferred_element_type=jnp.float32) + b3_ref[...]
    h3 = jnp.maximum(h3, 0.0)
    logits = jnp.dot(h3.astype(jnp.bfloat16), w4_ref[...],
                     preferred_element_type=jnp.float32) + b4_ref[...]

    # sigmoid via EUP: exp(-x) then approximate reciprocal (error << bf16 ulp).
    recon = pl.reciprocal(1.0 + jnp.exp(-logits), approx=True)
    recon_ref[...] = recon.astype(jnp.bfloat16)


def init_params(key):
    """Deterministic parameter init (shapes mirror the nn.Linear layers)."""
    ks = jax.random.split(key, 10)

    def linear(kw, kb, fan_in, fan_out):
        # PyTorch default: U(-1/sqrt(fan_in), 1/sqrt(fan_in))
        bound = 1.0 / jnp.sqrt(jnp.float32(fan_in))
        w = jax.random.uniform(kw, (fan_in, fan_out), jnp.float32, -bound, bound)
        b = jax.random.uniform(kb, (1, fan_out), jnp.float32, -bound, bound)
        return w, b

    w1, b1 = linear(ks[0], ks[1], INPUT_DIM, HIDDEN_DIM)
    w21, b21 = linear(ks[2], ks[3], HIDDEN_DIM, LATENT_DIM)
    w22, b22 = linear(ks[4], ks[5], HIDDEN_DIM, LATENT_DIM)
    w3, b3 = linear(ks[6], ks[7], LATENT_DIM, HIDDEN_DIM)
    w4, b4 = linear(ks[8], ks[9], HIDDEN_DIM, INPUT_DIM)
    return dict(w1=w1, b1=b1, w21=w21, b21=b21, w22=w22, b22=b22,
                w3=w3, b3=b3, w4=w4, b4=b4)


def _pad2(a, rows, cols, dtype):
    return jnp.pad(a, ((0, rows - a.shape[0]), (0, cols - a.shape[1]))).astype(dtype)


def prepare_params(params):
    """One-time: zero-pad hidden/latent axes to lane-aligned widths, fuse the two
    encoder heads, cast matmul operands to bf16 (biases stay f32). Input/output
    axes stay at their native 784 width."""
    w1 = _pad2(params["w1"], INPUT_DIM, HIDDEN_PAD, jnp.bfloat16)   # (784, 512)
    b1 = _pad2(params["b1"], 1, HIDDEN_PAD, jnp.float32)            # (1, 512)

    w21 = _pad2(params["w21"], HIDDEN_PAD, LATENT_PAD, jnp.float32)
    w22 = _pad2(params["w22"], HIDDEN_PAD, LATENT_PAD, jnp.float32)
    wml = jnp.concatenate([w21, w22], axis=1).astype(jnp.bfloat16)  # (512, 256)
    b21 = _pad2(params["b21"], 1, LATENT_PAD, jnp.float32)
    b22 = _pad2(params["b22"], 1, LATENT_PAD, jnp.float32)
    bml = jnp.concatenate([b21, b22], axis=1)                       # (1, 256) f32

    w3 = _pad2(params["w3"], LATENT_PAD, HIDDEN_PAD, jnp.bfloat16)  # (128, 512)
    b3 = _pad2(params["b3"], 1, HIDDEN_PAD, jnp.float32)            # (1, 512)
    w4 = _pad2(params["w4"], HIDDEN_PAD, INPUT_DIM, jnp.bfloat16)   # (512, 784)
    b4 = _pad2(params["b4"], 1, INPUT_DIM, jnp.float32)             # (1, 784)
    return (w1, b1, wml, bml, w3, b3, w4, b4)


@jax.jit
def vae_forward(x, eps, padded_params):
    """x: any shape flattening to (B, INPUT_DIM); eps: (B, LATENT_DIM) std normal.
    Returns (recon [bf16], mu [f32], logvar [f32])."""
    x2d = x.reshape(-1, INPUT_DIM).astype(jnp.float32)
    B = x2d.shape[0]
    tm, b_pad = _choose_tiling(B)

    # Row-pad only (jnp.pad fuses into the producer). x stays 784 wide so x@W1
    # runs with K=784 and no extra padded-copy HBM pass.
    x_p = jnp.pad(x2d, ((0, b_pad - B), (0, 0))).astype(jnp.bfloat16)
    eps_p = jnp.pad(eps.astype(jnp.float32),
                    ((0, b_pad - B), (0, LATENT_PAD - LATENT_DIM)))

    w1, b1, wml, bml, w3, b3, w4, b4 = padded_params

    row_map = lambda i: (i, 0)    # batch-tiled arrays
    const_map = lambda i: (0, 0)  # weights/biases: resident across grid steps

    in_specs = [
        pl.BlockSpec((tm, INPUT_DIM), row_map),
        pl.BlockSpec((tm, LATENT_PAD), row_map),
        pl.BlockSpec(w1.shape, const_map),
        pl.BlockSpec(b1.shape, const_map),
        pl.BlockSpec(wml.shape, const_map),
        pl.BlockSpec(bml.shape, const_map),
        pl.BlockSpec(w3.shape, const_map),
        pl.BlockSpec(b3.shape, const_map),
        pl.BlockSpec(w4.shape, const_map),
        pl.BlockSpec(b4.shape, const_map),
    ]
    out_specs = (
        pl.BlockSpec((tm, INPUT_DIM), row_map),
        pl.BlockSpec((tm, ML_PAD), row_map),
    )

    flops = 2 * b_pad * (INPUT_DIM * HIDDEN_PAD + HIDDEN_PAD * ML_PAD
                         + LATENT_PAD * HIDDEN_PAD + HIDDEN_PAD * INPUT_DIM)
    weight_bytes = sum(int(a.size) * a.dtype.itemsize
                       for a in (w1, b1, wml, bml, w3, b3, w4, b4))
    act_bytes = (int(x_p.size) * 2 + int(eps_p.size) * 4        # inputs
                 + b_pad * INPUT_DIM * 2 + b_pad * ML_PAD * 4)  # outputs
    cost = pl.CostEstimate(
        flops=int(flops),
        transcendentals=int(b_pad * (LATENT_PAD + 2 * INPUT_DIM)),
        bytes_accessed=int(weight_bytes + act_bytes))

    recon_p, ml_p = pl.pallas_call(
        vae_kernel,
        grid=(b_pad // tm,),
        out_shape=(
            jax.ShapeDtypeStruct((b_pad, INPUT_DIM), jnp.bfloat16),
            jax.ShapeDtypeStruct((b_pad, ML_PAD), jnp.float32),
        ),
        in_specs=in_specs,
        out_specs=out_specs,
        compiler_params=pltpu.CompilerParams(
            dimension_semantics=("parallel",)),
        cost_estimate=cost,
    )(x_p, eps_p, w1, b1, wml, bml, w3, b3, w4, b4)

    recon = recon_p[:B]                                    # (B, 784) bf16
    mu = ml_p[:B, :LATENT_DIM]                             # (B, 20) f32
    logvar = ml_p[:B, LATENT_PAD:LATENT_PAD + LATENT_DIM]  # (B, 20) f32
    return recon, mu, logvar


def vae_forward_ref(x, eps, params):
    """Pure-JAX f32 reference for correctness check."""
    x2d = x.reshape(-1, INPUT_DIM).astype(jnp.float32)
    h1 = jnp.maximum(x2d @ params["w1"] + params["b1"], 0.0)
    mu = h1 @ params["w21"] + params["b21"]
    logvar = h1 @ params["w22"] + params["b22"]
    z = mu + eps * jnp.exp(0.5 * logvar)
    h3 = jnp.maximum(z @ params["w3"] + params["b3"], 0.0)
    recon = jax.nn.sigmoid(h3 @ params["w4"] + params["b4"])
    return recon, mu, logvar


if __name__ == "__main__":
    key = jax.random.PRNGKey(0)
    k_param, k_x, k_eps = jax.random.split(key, 3)

    # Small MNIST-like batch: (B, C, H, W) = (2, 1, 28, 28) -> flattened (2, 784).
    x = jax.random.normal(k_x, (2, 1, 28, 28), jnp.float32)
    B = 2
    # torch.randn_like(std) equivalent: noise is generated deterministically here
    # and passed into the kernel (reparameterization trick is otherwise identical).
    eps = jax.random.normal(k_eps, (B, LATENT_DIM), jnp.float32)

    params = init_params(k_param)
    padded_params = prepare_params(params)

    recon, mu, logvar = vae_forward(x, eps, padded_params)
    jax.block_until_ready((recon, mu, logvar))

    # Correctness check vs pure-JAX f32 reference (tolerances loosened for bf16
    # matmul operands and bf16 recon output).
    r_ref, mu_r, lv_r = vae_forward_ref(x, eps, params)
    assert recon.shape == (B, INPUT_DIM)
    assert mu.shape == (B, LATENT_DIM) and logvar.shape == (B, LATENT_DIM)
    assert jnp.allclose(recon.astype(jnp.float32), r_ref, atol=5e-2, rtol=5e-2)
    assert jnp.allclose(mu, mu_r, atol=5e-2, rtol=5e-2)
    assert jnp.allclose(logvar, lv_r, atol=5e-2, rtol=5e-2)

    print("KERNEL_OK")
</pallas_src>

<mosaic_0001>
module attributes {stable_mosaic.version = 11 : i64} {
  func.func @vae_kernel(%arg0: i32, %arg1: memref<8x784xbf16, #tpu.memory_space<vmem>>, %arg2: memref<8x128xf32, #tpu.memory_space<vmem>>, %arg3: memref<784x512xbf16, #tpu.memory_space<vmem>>, %arg4: memref<1x512xf32, #tpu.memory_space<vmem>>, %arg5: memref<512x256xbf16, #tpu.memory_space<vmem>>, %arg6: memref<1x256xf32, #tpu.memory_space<vmem>>, %arg7: memref<128x512xbf16, #tpu.memory_space<vmem>>, %arg8: memref<1x512xf32, #tpu.memory_space<vmem>>, %arg9: memref<512x784xbf16, #tpu.memory_space<vmem>>, %arg10: memref<1x784xf32, #tpu.memory_space<vmem>>, %arg11: memref<8x784xbf16, #tpu.memory_space<vmem>>, %arg12: memref<8x256xf32, #tpu.memory_space<vmem>>) attributes {dimension_semantics = [#tpu.dimension_semantics<parallel>], iteration_bounds = array<i64: 1>, scalar_prefetch = 0 : i64, scratch_operands = 0 : i64, tpu.core_type = #tpu.core_type<tc>, window_params = [{transform_indices = @transform_0, window_bounds = array<i64: 8, 784>}, {transform_indices = @transform_1, window_bounds = array<i64: 8, 128>}, {pipeline_mode = #tpu.pipeline_mode<synchronous>, transform_indices = @transform_2, window_bounds = array<i64: 784, 512>}, {pipeline_mode = #tpu.pipeline_mode<synchronous>, transform_indices = @transform_3, window_bounds = array<i64: 1, 512>}, {pipeline_mode = #tpu.pipeline_mode<synchronous>, transform_indices = @transform_4, window_bounds = array<i64: 512, 256>}, {pipeline_mode = #tpu.pipeline_mode<synchronous>, transform_indices = @transform_5, window_bounds = array<i64: 1, 256>}, {pipeline_mode = #tpu.pipeline_mode<synchronous>, transform_indices = @transform_6, window_bounds = array<i64: 128, 512>}, {pipeline_mode = #tpu.pipeline_mode<synchronous>, transform_indices = @transform_7, window_bounds = array<i64: 1, 512>}, {pipeline_mode = #tpu.pipeline_mode<synchronous>, transform_indices = @transform_8, window_bounds = array<i64: 512, 784>}, {pipeline_mode = #tpu.pipeline_mode<synchronous>, transform_indices = @transform_9, window_bounds = array<i64: 1, 784>}, {transform_indices = @transform_10, window_bounds = array<i64: 8, 784>}, {transform_indices = @transform_11, window_bounds = array<i64: 8, 256>}]} {
    %c0 = arith.constant 0 : index
    %c0_0 = arith.constant 0 : index
    %0 = vector.load %arg1[%c0, %c0_0] : memref<8x784xbf16, #tpu.memory_space<vmem>>, vector<8x784xbf16>
    %c0_1 = arith.constant 0 : index
    %c0_2 = arith.constant 0 : index
    %1 = vector.load %arg3[%c0_1, %c0_2] : memref<784x512xbf16, #tpu.memory_space<vmem>>, vector<784x512xbf16>
    %cst = arith.constant dense<0.000000e+00> : vector<8x512xf32>
    %2 = tpu.matmul %0, %1, %cst {dimension_numbers = #tpu.dot_dimension_numbers<[1], [0], [0], [1], [0, 0, 1, 1], [], []>} : vector<8x784xbf16>, vector<784x512xbf16>, vector<8x512xf32> -> vector<8x512xf32>
    %c0_3 = arith.constant 0 : index
    %c0_4 = arith.constant 0 : index
    %3 = vector.load %arg4[%c0_3, %c0_4] : memref<1x512xf32, #tpu.memory_space<vmem>>, vector<1x512xf32>
    %4 = vector.broadcast %3 : vector<1x512xf32> to vector<8x512xf32>
    %5 = arith.addf %2, %4 : vector<8x512xf32>
    %cst_5 = arith.constant 0.000000e+00 : f32
    %6 = vector.broadcast %cst_5 : f32 to vector<8x512xf32>
    %7 = arith.maximumf %5, %6 : vector<8x512xf32>
    %8 = arith.truncf %7 : vector<8x512xf32> to vector<8x512xbf16>
    %c0_6 = arith.constant 0 : index
    %c0_7 = arith.constant 0 : index
    %9 = vector.load %arg5[%c0_6, %c0_7] : memref<512x256xbf16, #tpu.memory_space<vmem>>, vector<512x256xbf16>
    %cst_8 = arith.constant dense<0.000000e+00> : vector<8x256xf32>
    %10 = tpu.matmul %8, %9, %cst_8 {dimension_numbers = #tpu.dot_dimension_numbers<[1], [0], [0], [1], [0, 0, 1, 1], [], []>} : vector<8x512xbf16>, vector<512x256xbf16>, vector<8x256xf32> -> vector<8x256xf32>
    %c0_9 = arith.constant 0 : index
    %c0_10 = arith.constant 0 : index
    %11 = vector.load %arg6[%c0_9, %c0_10] : memref<1x256xf32, #tpu.memory_space<vmem>>, vector<1x256xf32>
    %12 = vector.broadcast %11 : vector<1x256xf32> to vector<8x256xf32>
    %13 = arith.addf %10, %12 : vector<8x256xf32>
    %c0_11 = arith.constant 0 : index
    %c0_12 = arith.constant 0 : index
    %14 = vector.load %arg12[%c0_11, %c0_12] : memref<8x256xf32, #tpu.memory_space<vmem>>, vector<8x256xf32>
    tpu.vector_store %arg12[%c0_11, %c0_12], %13 {strides = array<i32>} : memref<8x256xf32, #tpu.memory_space<vmem>>, vector<8x256xf32>,
    %15 = vector.extract_strided_slice %13 {offsets = [0, 0], sizes = [8, 128], strides = [1, 1]} : vector<8x256xf32> to vector<8x128xf32>
    %16 = vector.extract_strided_slice %13 {offsets = [0, 128], sizes = [8, 128], strides = [1, 1]} : vector<8x256xf32> to vector<8x128xf32>
    %cst_13 = arith.constant 5.000000e-01 : f32
    %17 = vector.broadcast %cst_13 : f32 to vector<8x128xf32>
    %18 = arith.mulf %17, %16 : vector<8x128xf32>
    %19 = math.exp %18 : vector<8x128xf32>
    %c0_14 = arith.constant 0 : index
    %c0_15 = arith.constant 0 : index
    %20 = vector.load %arg2[%c0_14, %c0_15] : memref<8x128xf32, #tpu.memory_space<vmem>>, vector<8x128xf32>
    %21 = arith.mulf %20, %19 : vector<8x128xf32>
    %22 = arith.addf %15, %21 : vector<8x128xf32>
    %23 = arith.truncf %22 : vector<8x128xf32> to vector<8x128xbf16>
    %c0_16 = arith.constant 0 : index
    %c0_17 = arith.constant 0 : index
    %24 = vector.load %arg7[%c0_16, %c0_17] : memref<128x512xbf16, #tpu.memory_space<vmem>>, vector<128x512xbf16>
    %cst_18 = arith.constant dense<0.000000e+00> : vector<8x512xf32>
    %25 = tpu.matmul %23, %24, %cst_18 {dimension_numbers = #tpu.dot_dimension_numbers<[1], [0], [0], [1], [0, 0, 1, 1], [], []>} : vector<8x128xbf16>, vector<128x512xbf16>, vector<8x512xf32> -> vector<8x512xf32>
    %c0_19 = arith.constant 0 : index
    %c0_20 = arith.constant 0 : index
    %26 = vector.load %arg8[%c0_19, %c0_20] : memref<1x512xf32, #tpu.memory_space<vmem>>, vector<1x512xf32>
    %27 = vector.broadcast %26 : vector<1x512xf32> to vector<8x512xf32>
    %28 = arith.addf %25, %27 : vector<8x512xf32>
    %cst_21 = arith.constant 0.000000e+00 : f32
    %29 = vector.broadcast %cst_21 : f32 to vector<8x512xf32>
    %30 = arith.maximumf %28, %29 : vector<8x512xf32>
    %31 = arith.truncf %30 : vector<8x512xf32> to vector<8x512xbf16>
    %c0_22 = arith.constant 0 : index
    %c0_23 = arith.constant 0 : index
    %32 = vector.load %arg9[%c0_22, %c0_23] : memref<512x784xbf16, #tpu.memory_space<vmem>>, vector<512x784xbf16>
    %cst_24 = arith.constant dense<0.000000e+00> : vector<8x784xf32>
    %33 = tpu.matmul %31, %32, %cst_24 {dimension_numbers = #tpu.dot_dimension_numbers<[1], [0], [0], [1], [0, 0, 1, 1], [], []>} : vector<8x512xbf16>, vector<512x784xbf16>, vector<8x784xf32> -> vector<8x784xf32>
    %c0_25 = arith.constant 0 : index
    %c0_26 = arith.constant 0 : index
    %34 = vector.load %arg10[%c0_25, %c0_26] : memref<1x784xf32, #tpu.memory_space<vmem>>, vector<1x784xf32>
    %35 = vector.broadcast %34 : vector<1x784xf32> to vector<8x784xf32>
    %36 = arith.addf %33, %35 : vector<8x784xf32>
    %cst_27 = arith.constant 0.000000e+00 : f32
    %37 = vector.broadcast %cst_27 : f32 to vector<8x784xf32>
    %38 = arith.subf %37, %36 : vector<8x784xf32>
    %39 = math.exp %38 : vector<8x784xf32>
    %cst_28 = arith.constant 1.000000e+00 : f32
    %40 = vector.broadcast %cst_28 : f32 to vector<8x784xf32>
    %41 = arith.addf %40, %39 : vector<8x784xf32>
    %42 = tpu.reciprocal %41 {approx = true} : vector<8x784xf32> -> vector<8x784xf32>
    %43 = arith.truncf %42 : vector<8x784xf32> to vector<8x784xbf16>
    %c0_29 = arith.constant 0 : index
    %c0_30 = arith.constant 0 : index
    %44 = vector.load %arg11[%c0_29, %c0_30] : memref<8x784xbf16, #tpu.memory_space<vmem>>, vector<8x784xbf16>
    tpu.vector_store %arg11[%c0_29, %c0_30], %43 {strides = array<i32>} : memref<8x784xbf16, #tpu.memory_space<vmem>>, vector<8x784xbf16>,
    return
  }
  func.func @transform_0(%arg0: i32) -> (i32, i32) {
    %c0_i32 = arith.constant 0 : i32
    %c0_i32_0 = arith.constant 0 : i32
    return %arg0, %c0_i32 : i32, i32
  }
  func.func @transform_1(%arg0: i32) -> (i32, i32) {
    %c0_i32 = arith.constant 0 : i32
    %c0_i32_0 = arith.constant 0 : i32
    return %arg0, %c0_i32 : i32, i32
  }
  func.func @transform_2(%arg0: i32) -> (i32, i32) {
    %c0_i32 = arith.constant 0 : i32
    %c0_i32_0 = arith.constant 0 : i32
    %c0_i32_1 = arith.constant 0 : i32
    return %c0_i32, %c0_i32_0 : i32, i32
  }
  func.func @transform_3(%arg0: i32) -> (i32, i32) {
    %c0_i32 = arith.constant 0 : i32
    %c0_i32_0 = arith.constant 0 : i32
    %c0_i32_1 = arith.constant 0 : i32
    return %c0_i32, %c0_i32_0 : i32, i32
  }
  func.func @transform_4(%arg0: i32) -> (i32, i32) {
    %c0_i32 = arith.constant 0 : i32
    %c0_i32_0 = arith.constant 0 : i32
    %c0_i32_1 = arith.constant 0 : i32
    return %c0_i32, %c0_i32_0 : i32, i32
  }
  func.func @transform_5(%arg0: i32) -> (i32, i32) {
    %c0_i32 = arith.constant 0 : i32
    %c0_i32_0 = arith.constant 0 : i32
    %c0_i32_1 = arith.constant 0 : i32
    return %c0_i32, %c0_i32_0 : i32, i32
  }
  func.func @transform_6(%arg0: i32) -> (i32, i32) {
    %c0_i32 = arith.constant 0 : i32
    %c0_i32_0 = arith.constant 0 : i32
    %c0_i32_1 = arith.constant 0 : i32
    return %c0_i32, %c0_i32_0 : i32, i32
  }
  func.func @transform_7(%arg0: i32) -> (i32, i32) {
    %c0_i32 = arith.constant 0 : i32
    %c0_i32_0 = arith.constant 0 : i32
    %c0_i32_1 = arith.constant 0 : i32
    return %c0_i32, %c0_i32_0 : i32, i32
  }
  func.func @transform_8(%arg0: i32) -> (i32, i32) {
    %c0_i32 = arith.constant 0 : i32
    %c0_i32_0 = arith.constant 0 : i32
    %c0_i32_1 = arith.constant 0 : i32
    return %c0_i32, %c0_i32_0 : i32, i32
  }
  func.func @transform_9(%arg0: i32) -> (i32, i32) {
    %c0_i32 = arith.constant 0 : i32
    %c0_i32_0 = arith.constant 0 : i32
    %c0_i32_1 = arith.constant 0 : i32
    return %c0_i32, %c0_i32_0 : i32, i32
  }
  func.func @transform_10(%arg0: i32) -> (i32, i32) {
    %c0_i32 = arith.constant 0 : i32
    %c0_i32_0 = arith.constant 0 : i32
    return %arg0, %c0_i32 : i32, i32
  }
  func.func @transform_11(%arg0: i32) -> (i32, i32) {
    %c0_i32 = arith.constant 0 : i32
    %c0_i32_0 = arith.constant 0 : i32
    return %arg0, %c0_i32 : i32, i32
  }
}

</mosaic_0001>

<bundles_post_ra>
// kernel: vae_forward.1
= control target key start
LH: loop header
LB: loop body
LE: loop exit
PB: predicated region body
PF: predicated region fallthrough
CT: control target
= control target key end

     0   :  { %vm1264_vm0 = vcmask 130048   ;;  %vm4233_vm1 = vcmask 125952   ;;  %s7374_s2 = inlined_call_operand.vmem [shape: bf16[784,512], index: 2, kind: input, shape index: {}]   ;;  %s7375_s0 = inlined_call_operand.vmem [shape: bf16[8,784], index: 0, kind: input, shape index: {}]   ;;  %s7376_s4 = inlined_call_operand.vmem [shape: bf16[512,256], index: 4, kind: input, shape index: {}]   ;;  %s7377_s3 = inlined_call_operand.vmem [shape: f32[1,512], index: 3, kind: input, shape index: {}]   ;;  %s7378_s6 = inlined_call_operand.vmem [shape: bf16[128,512], index: 6, kind: input, shape index: {}]   ;;  %s7379_s8 = inlined_call_operand.vmem [shape: bf16[512,784], index: 8, kind: input, shape index: {}]   ;;  %s7380_s5 = inlined_call_operand.vmem [shape: f32[1,256], index: 5, kind: input, shape index: {}]   ;;  %s7381_s11 = inlined_call_operand.vmem [shape: f32[8,256], index: 11, kind: output, shape index: {1}]   ;;  %s7382_s1 = inlined_call_operand.vmem [shape: f32[8,128], index: 1, kind: input, shape index: {}]   ;;  %s7383_s7 = inlined_call_operand.vmem [shape: f32[1,512], index: 7, kind: input, shape index: {}]   ;;  %s7384_s9 = inlined_call_operand.vmem [shape: f32[1,784], index: 9, kind: input, shape index: {}]   ;;  %s7385_s10 = inlined_call_operand.vmem [shape: bf16[8,784], index: 10, kind: output, shape index: {0}]  }
   0x1   :  { %v4821_v0 = vld [vmem:[%s7374_s2 + $0xe4] ss:$16 sps:$4 sm:$0xff]   ;;  %v4825_v2 = vld [vmem:[%s7374_s2 + $0xe0] ss:$16 sps:$4 sm:$0xff]   ;;  %v39_v50 = vld [vmem:[%s7375_s0 + $0x8] sm:$0xff] }
   0x2   :  { %v4823_v1 = vld [vmem:[%s7374_s2 + $0x2e4] ss:$16 sps:$4 sm:$0xff]   ;;  %1268 = vmatprep.subr.bf16.mxu0 %v4821_v0  ;;  %v4826_v3 = vld [vmem:[%s7374_s2 + $0x2e0] ss:$16 sps:$4 sm:$0xff]   ;;  %v5832_v52 = vcombine.high %v39_v50, %v39_v50 }
   0x3   :  { %1309 = vmatprep.subr.bf16.mxu1 %v4823_v1  ;;  %v4827_v4 = vld [vmem:[%s7374_s2 + $0xc4] ss:$16 sps:$4 sm:$0xff]   ;;  %1269 = vmatpush1.bf16.msra.mxu0 %v4825_v2  ;;  %v4831_v6 = vld [vmem:[%s7374_s2 + $0xc0] ss:$16 sps:$4 sm:$0xff]  }
   0x4   :  { %1310 = vmatpush1.bf16.msra.mxu1 %v4826_v3  ;;  %v4829_v5 = vld [vmem:[%s7374_s2 + $0x2c4] ss:$16 sps:$4 sm:$0xff]   ;;  %1270 = vmatprep.subr.bf16.mxu0 %v4827_v4  ;;  %v4832_v7 = vld [vmem:[%s7374_s2 + $0x2c0] ss:$16 sps:$4 sm:$0xff]  }
   0x5   :  { %1311 = vmatprep.subr.bf16.mxu1 %v4829_v5  ;;  %v4833_v8 = vld [vmem:[%s7374_s2 + $0xa4] ss:$16 sps:$4 sm:$0xff]   ;;  %v4837_v10 = vld [vmem:[%s7374_s2 + $0xa0] ss:$16 sps:$4 sm:$0xff]   ;;  %1341 = vmatprep.mubr.bf16.mxu1 %v5832_v52 }
   0x6   :  { %v4835_v9 = vld [vmem:[%s7374_s2 + $0x2a4] ss:$16 sps:$4 sm:$0xff]   ;;  %v4838_v11 = vld [vmem:[%s7374_s2 + $0x2a0] ss:$16 sps:$4 sm:$0xff]  }
   0x7   :  { %1271 = vmatpush1.bf16.msra.mxu0 %v4831_v6  ;;  %v4839_v12 = vld [vmem:[%s7374_s2 + $0x84] ss:$16 sps:$4 sm:$0xff]   ;;  %v4843_v14 = vld [vmem:[%s7374_s2 + $0x80] ss:$16 sps:$4 sm:$0xff]  }
   0x8   :  { %1312 = vmatpush1.bf16.msra.mxu1 %v4832_v7  ;;  %1272 = vmatprep.subr.bf16.mxu0 %v4833_v8  ;;  %v4841_v13 = vld [vmem:[%s7374_s2 + $0x284] ss:$16 sps:$4 sm:$0xff]   ;;  %v4844_v15 = vld [vmem:[%s7374_s2 + $0x280] ss:$16 sps:$4 sm:$0xff]   ;;  %v5889_v7 = vcombine.low %v39_v50, %v39_v50  ;;  %v4979_v50 = vld [vmem:[%s7374_s2 + $0x1e8] ss:$16 sps:$4 sm:$0xff]  }
   0x9   :  { %1313 = vmatprep.subr.bf16.mxu1 %v4835_v9  ;;  %v4845_v16 = vld [vmem:[%s7374_s2 + $0x64] ss:$16 sps:$4 sm:$0xff]   ;;  %v4849_v18 = vld [vmem:[%s7374_s2 + $0x60] ss:$16 sps:$4 sm:$0xff]  }
   0xa   :  { %v4847_v17 = vld [vmem:[%s7374_s2 + $0x264] ss:$16 sps:$4 sm:$0xff]   ;;  %v4850_v19 = vld [vmem:[%s7374_s2 + $0x260] ss:$16 sps:$4 sm:$0xff]  }
   0xb   :  { %1273 = vmatpush1.bf16.msra.mxu0 %v4837_v10  ;;  %v4851_v20 = vld [vmem:[%s7374_s2 + $0x44] ss:$16 sps:$4 sm:$0xff]   ;;  %v4855_v22 = vld [vmem:[%s7374_s2 + $0x40] ss:$16 sps:$4 sm:$0xff]  }
   0xc   :  { %1314 = vmatpush1.bf16.msra.mxu1 %v4838_v11  ;;  %1274 = vmatprep.subr.bf16.mxu0 %v4839_v12  ;;  %v4853_v21 = vld [vmem:[%s7374_s2 + $0x244] ss:$16 sps:$4 sm:$0xff]   ;;  %v4856_v23 = vld [vmem:[%s7374_s2 + $0x240] ss:$16 sps:$4 sm:$0xff]   ;;  %v4933_v11 = vld [vmem:[%s7374_s2 + $0xec] ss:$16 sps:$4 sm:$0xff]  }
   0xd   :  { %1315 = vmatprep.subr.bf16.mxu1 %v4841_v13  ;;  %v4857_v24 = vld [vmem:[%s7374_s2 + $0x24] ss:$16 sps:$4 sm:$0xff]   ;;  %v4861_v26 = vld [vmem:[%s7374_s2 + $0x20] ss:$16 sps:$4 sm:$0xff]   ;;  %v5616_v13 = vmov 0  }
   0xe   :  { %v4859_v25 = vld [vmem:[%s7374_s2 + $0x224] ss:$16 sps:$4 sm:$0xff]   ;;  %v4862_v27 = vld [vmem:[%s7374_s2 + $0x220] ss:$16 sps:$4 sm:$0xff]  }
   0xf   :  { %1275 = vmatpush1.bf16.msra.mxu0 %v4843_v14  ;;  %v4863_v28 = vld [vmem:[%s7374_s2 + $0x4] ss:$16 sps:$4 sm:$0xff]   ;;  %v4867_v30 = vld [vmem:[%s7374_s2] ss:$16 sps:$4 sm:$0xff]  }
  0x10   :  { %1316 = vmatpush1.bf16.msra.mxu1 %v4844_v15  ;;  %1276 = vmatprep.subr.bf16.mxu0 %v4845_v16  ;;  %v4865_v29 = vld [vmem:[%s7374_s2 + $0x204] ss:$16 sps:$4 sm:$0xff]   ;;  %v4868_v31 = vld [vmem:[%s7374_s2 + $0x200] ss:$16 sps:$4 sm:$0xff]   ;;  %v5915_v15 = vld [vmem:[%s7375_s0 + $0x18] ss:$0 sps:$4 sm:$0xff]  }
  0x11   :  { %1317 = vmatprep.subr.bf16.mxu1 %v4847_v17  ;;  %v4869_v32 = vld [vmem:[%s7374_s2 + $0x1e4] ss:$16 sps:$4 sm:$0xff]   ;;  %v4873_v34 = vld [vmem:[%s7374_s2 + $0x1e0] ss:$16 sps:$4 sm:$0xff]   ;;  %v4931_v16 = vld [vmem:[%s7374_s2 + $0xe8] ss:$16 sps:$4 sm:$0xff]  }
  0x12   :  { %v4871_v33 = vld [vmem:[%s7374_s2 + $0x3e4] ss:$16 sps:$4 sm:$0xff]   ;;  %v4874_v35 = vld [vmem:[%s7374_s2 + $0x3e0] ss:$16 sps:$4 sm:$0xff]  }
  0x13   :  { %1277 = vmatpush1.bf16.msra.mxu0 %v4849_v18  ;;  %v4875_v36 = vld [vmem:[%s7374_s2 + $0x1c4] ss:$16 sps:$4 sm:$0xff]   ;;  %v4879_v38 = vld [vmem:[%s7374_s2 + $0x1c0] ss:$16 sps:$4 sm:$0xff]   ;;  %v4939_v18 = vld [vmem:[%s7374_s2 + $0xcc] ss:$16 sps:$4 sm:$0xff]  }
  0x14   :  { %1318 = vmatpush1.bf16.msra.mxu1 %v4850_v19  ;;  %1278 = vmatprep.subr.bf16.mxu0 %v4851_v20  ;;  %v4877_v37 = vld [vmem:[%s7374_s2 + $0x3c4] ss:$16 sps:$4 sm:$0xff]   ;;  %v4880_v39 = vld [vmem:[%s7374_s2 + $0x3c0] ss:$16 sps:$4 sm:$0xff]   ;;  %v4937_v20 = vld [vmem:[%s7374_s2 + $0xc8] ss:$16 sps:$4 sm:$0xff]  }
  0x15   :  { %1319 = vmatprep.subr.bf16.mxu1 %v4853_v21  ;;  %v4881_v40 = vld [vmem:[%s7374_s2 + $0x1a4] ss:$16 sps:$4 sm:$0xff]   ;;  %v4885_v42 = vld [vmem:[%s7374_s2 + $0x1a0] ss:$16 sps:$4 sm:$0xff]  }
  0x16   :  { %v4883_v41 = vld [vmem:[%s7374_s2 + $0x3a4] ss:$16 sps:$4 sm:$0xff]   ;;  %v4886_v43 = vld [vmem:[%s7374_s2 + $0x3a0] ss:$16 sps:$4 sm:$0xff]  }
  0x17   :  { %1279 = vmatpush1.bf16.msra.mxu0 %v4855_v22  ;;  %v4887_v44 = vld [vmem:[%s7374_s2 + $0x184] ss:$16 sps:$4 sm:$0xff]   ;;  %v4891_v46 = vld [vmem:[%s7374_s2 + $0x180] ss:$16 sps:$4 sm:$0xff]   ;;  %v4945_v22 = vld [vmem:[%s7374_s2 + $0xac] ss:$16 sps:$4 sm:$0xff]  }
  0x18   :  { %1320 = vmatpush1.bf16.msra.mxu1 %v4856_v23  ;;  %1280 = vmatprep.subr.bf16.mxu0 %v4857_v24  ;;  %v4889_v45 = vld [vmem:[%s7374_s2 + $0x384] ss:$16 sps:$4 sm:$0xff]   ;;  %v4892_v48 = vld [vmem:[%s7374_s2 + $0x380] ss:$16 sps:$4 sm:$0xff]   ;;  %v4943_v24 = vld [vmem:[%s7374_s2 + $0xa8] ss:$16 sps:$4 sm:$0xff]  }
  0x19   :  { %1321 = vmatprep.subr.bf16.mxu1 %v4859_v25  ;;  %v38_v47 = vld [vmem:[%s7375_s0] sm:$0xff] }
  0x1a   :  { %v5824_v49 = vcombine.high %v38_v47, %v38_v47  ;;  %v4893_v51 = vld [vmem:[%s7374_s2 + $0x164] ss:$16 sps:$4 sm:$0xff]   ;;  %v4897_v54 = vld [vmem:[%s7374_s2 + $0x160] ss:$16 sps:$4 sm:$0xff]   ;;  %v5887_v6 = vcombine.low %v38_v47, %v38_v47 }
  0x1b   :  { %1281 = vmatpush1.bf16.msra.mxu0 %v4861_v26  ;;  %v4895_v53 = vld [vmem:[%s7374_s2 + $0x364] ss:$16 sps:$4 sm:$0xff]   ;;  %v4898_v55 = vld [vmem:[%s7374_s2 + $0x360] ss:$16 sps:$4 sm:$0xff]   ;;  %v4951_v26 = vld [vmem:[%s7374_s2 + $0x8c] ss:$16 sps:$4 sm:$0xff]  }
  0x1c   :  { %1322 = vmatpush1.bf16.msra.mxu1 %v4862_v27  ;;  %1282 = vmatprep.subr.bf16.mxu0 %v4863_v28  ;;  %v4899_v56 = vld [vmem:[%s7374_s2 + $0x144] ss:$16 sps:$4 sm:$0xff]   ;;  %v4903_v58 = vld [vmem:[%s7374_s2 + $0x140] ss:$16 sps:$4 sm:$0xff]   ;;  %v4949_v28 = vld [vmem:[%s7374_s2 + $0x88] ss:$16 sps:$4 sm:$0xff]  }
  0x1d   :  { %1323 = vmatprep.subr.bf16.mxu1 %v4865_v29  ;;  %1300 = vmatprep.mubr.bf16.mxu0 %v5824_v49  ;;  %v4901_v57 = vld [vmem:[%s7374_s2 + $0x344] ss:$16 sps:$4 sm:$0xff]   ;;  %v4904_v59 = vld [vmem:[%s7374_s2 + $0x340] ss:$16 sps:$4 sm:$0xff]  }
  0x1e   :  { %v4905_v60 = vld [vmem:[%s7374_s2 + $0x124] ss:$16 sps:$4 sm:$0xff]   ;;  %v4909_v62 = vld [vmem:[%s7374_s2 + $0x120] ss:$16 sps:$4 sm:$0xff]  }
  0x1f   :  { %1283 = vmatpush1.bf16.msra.mxu0 %v4867_v30  ;;  %v4907_v61 = vld [vmem:[%s7374_s2 + $0x324] ss:$16 sps:$4 sm:$0xff]   ;;  %v4910_v63 = vld [vmem:[%s7374_s2 + $0x320] ss:$16 sps:$4 sm:$0xff]   ;;  %v4957_v30 = vld [vmem:[%s7374_s2 + $0x6c] ss:$16 sps:$4 sm:$0xff]  }
  0x20   :  { %1324 = vmatpush1.bf16.msra.mxu1 %v4868_v31  ;;  %1284 = vmatprep.subr.bf16.mxu0 %v4869_v32  ;;  %v4911_v0 = vld [vmem:[%s7374_s2 + $0x104] ss:$16 sps:$4 sm:$0xff]   ;;  %v4915_v2 = vld [vmem:[%s7374_s2 + $0x100] ss:$16 sps:$4 sm:$0xff]  }
  0x21   :  { %1325 = vmatprep.subr.bf16.mxu1 %v4871_v33  ;;  %v4913_v1 = vld [vmem:[%s7374_s2 + $0x304] ss:$16 sps:$4 sm:$0xff]   ;;  %v4916_v3 = vld [vmem:[%s7374_s2 + $0x300] ss:$16 sps:$4 sm:$0xff]  }
  0x22   :  { %v4924_v4 = vld [vmem:[%s7374_s2 + $0x4e4] ss:$16 sps:$4 sm:$0xff]   ;;  %v4922_v8 = vld [vmem:[%s7374_s2 + $0x4e0] ss:$16 sps:$4 sm:$0xff]  }
  0x23   :  { %1285 = vmatpush2.bf16.msra.mxu0 %v4873_v34  ;;  %v4927_v5 = vld [vmem:[%s7374_s2 + $0x604] ss:$16 sps:$4 sm:$0xff]   ;;  %v4925_v9 = vld [vmem:[%s7374_s2 + $0x600] ss:$16 sps:$4 sm:$0xff]   ;;  %v4955_v34 = vld [vmem:[%s7374_s2 + $0x68] ss:$16 sps:$4 sm:$0xff]  }
  0x24   :  { %1326 = vmatpush2.bf16.msra.mxu1 %v4874_v35  ;;  %1286 = vmatprep.subr.bf16.mxu0 %v4875_v36  ;;  %v4930_v10 = vld [vmem:[%s7374_s2 + $0x4c4] ss:$16 sps:$4 sm:$0xff]   ;;  %v4928_v12 = vld [vmem:[%s7374_s2 + $0x4c0] ss:$16 sps:$4 sm:$0xff]   ;;  %v4963_v36 = vld [vmem:[%s7374_s2 + $0x4c] ss:$16 sps:$4 sm:$0xff]  }
  0x25   :  { %1327 = vmatprep.subr.bf16.mxu1 %v4877_v37  ;;  %v4936_v14 = vld [vmem:[%s7374_s2 + $0x4a4] ss:$16 sps:$4 sm:$0xff]   ;;  %v4934_v17 = vld [vmem:[%s7374_s2 + $0x4a0] ss:$16 sps:$4 sm:$0xff]  }
  0x26   :  { %v4942_v19 = vld [vmem:[%s7374_s2 + $0x484] ss:$16 sps:$4 sm:$0xff]   ;;  %v4940_v21 = vld [vmem:[%s7374_s2 + $0x480] ss:$16 sps:$4 sm:$0xff]  }
  0x27   :  { %1287 = vmatpush2.bf16.msra.mxu0 %v4879_v38  ;;  %v4948_v23 = vld [vmem:[%s7374_s2 + $0x464] ss:$16 sps:$4 sm:$0xff]   ;;  %v4946_v25 = vld [vmem:[%s7374_s2 + $0x460] ss:$16 sps:$4 sm:$0xff]   ;;  %v4961_v38 = vld [vmem:[%s7374_s2 + $0x48] ss:$16 sps:$4 sm:$0xff]  }
  0x28   :  { %1328 = vmatpush2.bf16.msra.mxu1 %v4880_v39  ;;  %1288 = vmatprep.subr.bf16.mxu0 %v4881_v40  ;;  %v4954_v27 = vld [vmem:[%s7374_s2 + $0x444] ss:$16 sps:$4 sm:$0xff]   ;;  %v4952_v29 = vld [vmem:[%s7374_s2 + $0x440] ss:$16 sps:$4 sm:$0xff]   ;;  %v4969_v40 = vld [vmem:[%s7374_s2 + $0x2c] ss:$16 sps:$4 sm:$0xff]  }
  0x29   :  { %1329 = vmatprep.subr.bf16.mxu1 %v4883_v41  ;;  %v4960_v31 = vld [vmem:[%s7374_s2 + $0x424] ss:$16 sps:$4 sm:$0xff]   ;;  %v4958_v35 = vld [vmem:[%s7374_s2 + $0x420] ss:$16 sps:$4 sm:$0xff]  }
  0x2a   :  { %v5971_v32 = vld [vmem:[%s7375_s0 + $0x10] sm:$0xff] }
  0x2b   :  { %1289 = vmatpush2.bf16.msra.mxu0 %v4885_v42  ;;  %v5975_v33 = vcombine.high %v5971_v32, %v5971_v32  ;;  %v4966_v37 = vld [vmem:[%s7374_s2 + $0x404] ss:$16 sps:$4 sm:$0xff]   ;;  %v4964_v39 = vld [vmem:[%s7374_s2 + $0x400] ss:$16 sps:$4 sm:$0xff]   ;;  %v4967_v42 = vld [vmem:[%s7374_s2 + $0x28] ss:$16 sps:$4 sm:$0xff]  }
  0x2c   :  { %1330 = vmatpush2.bf16.msra.mxu1 %v4886_v43  ;;  %1290 = vmatprep.subr.bf16.mxu0 %v4887_v44  ;;  %v4972_v41 = vld [vmem:[%s7374_s2 + $0x5e4] ss:$16 sps:$4 sm:$0xff]   ;;  %v4970_v43 = vld [vmem:[%s7374_s2 + $0x5e0] ss:$16 sps:$4 sm:$0xff]   ;;  %v4975_v44 = vld [vmem:[%s7374_s2 + $0xc] ss:$16 sps:$4 sm:$0xff]  }
  0x2d   :  { %1331 = vmatprep.subr.bf16.mxu1 %v4889_v45  ;;  %v4978_v45 = vld [vmem:[%s7374_s2 + $0x5c4] ss:$16 sps:$4 sm:$0xff]   ;;  %v4976_v47 = vld [vmem:[%s7374_s2 + $0x5c0] ss:$16 sps:$4 sm:$0xff]  }
  0x2f   :  { %1291 = vmatpush2.bf16.msra.mxu0 %v4891_v46  ;;  %v4973_v46 = vld [vmem:[%s7374_s2 + $0x8] ss:$16 sps:$4 sm:$0xff]  }
  0x30   :  { %1332 = vmatpush2.bf16.msra.mxu1 %v4892_v48  ;;  %1292 = vmatprep.subr.bf16.mxu0 %v4893_v51  ;;  %v4981_v48 = vld [vmem:[%s7374_s2 + $0x1ec] ss:$16 sps:$4 sm:$0xff]   ;;  %v4982_v51 = vld [vmem:[%s7374_s2 + $0x5a0] ss:$16 sps:$4 sm:$0xff]  }
  0x31   :  { %1333 = vmatprep.subr.bf16.mxu1 %v4895_v53  ;;  %v4987_v53 = vld [vmem:[%s7374_s2 + $0x1cc] ss:$16 sps:$4 sm:$0xff]  }
  0x33   :  { %1293 = vmatpush2.bf16.msra.mxu0 %v4897_v54  ;;  %v4990_v54 = vld [vmem:[%s7374_s2 + $0x584] ss:$16 sps:$4 sm:$0xff]  }
  0x34   :  { %1334 = vmatpush2.bf16.msra.mxu1 %v4898_v55  ;;  %1294 = vmatprep.subr.bf16.mxu0 %v4899_v56  ;;  %v4985_v55 = vld [vmem:[%s7374_s2 + $0x1c8] ss:$16 sps:$4 sm:$0xff]   ;;  %v4988_v56 = vld [vmem:[%s7374_s2 + $0x580] ss:$16 sps:$4 sm:$0xff]  }
  0x35   :  { %1335 = vmatprep.subr.bf16.mxu1 %v4901_v57  ;;  %v4993_v57 = vld [vmem:[%s7374_s2 + $0x1ac] ss:$16 sps:$4 sm:$0xff]  }
  0x37   :  { %1295 = vmatpush2.bf16.msra.mxu0 %v4903_v58  ;;  %v4996_v58 = vld [vmem:[%s7374_s2 + $0x564] ss:$16 sps:$4 sm:$0xff]  }
  0x38   :  { %1336 = vmatpush2.bf16.msra.mxu1 %v4904_v59  ;;  %1296 = vmatprep.subr.bf16.mxu0 %v4905_v60  ;;  %v4991_v59 = vld [vmem:[%s7374_s2 + $0x1a8] ss:$16 sps:$4 sm:$0xff]   ;;  %v4994_v60 = vld [vmem:[%s7374_s2 + $0x560] ss:$16 sps:$4 sm:$0xff]  }
  0x39   :  { %1337 = vmatprep.subr.bf16.mxu1 %v4907_v61  ;;  %v4999_v61 = vld [vmem:[%s7374_s2 + $0x18c] ss:$16 sps:$4 sm:$0xff]  }
  0x3b   :  { %1297 = vmatpush2.bf16.msra.mxu0 %v4909_v62  ;;  %v5002_v62 = vld [vmem:[%s7374_s2 + $0x544] ss:$16 sps:$4 sm:$0xff]  }
  0x3c   :  { %1338 = vmatpush2.bf16.msra.mxu1 %v4910_v63  ;;  %1298 = vmatprep.subr.bf16.mxu0 %v4911_v0  ;;  %v4997_v63 = vld [vmem:[%s7374_s2 + $0x188] ss:$16 sps:$4 sm:$0xff]   ;;  %v5000_v0 = vld [vmem:[%s7374_s2 + $0x540] ss:$16 sps:$4 sm:$0xff]  }
  0x3d   :  { %1339 = vmatprep.subr.bf16.mxu1 %v4913_v1  ;;  %v5005_v1 = vld [vmem:[%s7374_s2 + $0x16c] ss:$16 sps:$4 sm:$0xff]  }
  0x3f   :  { %1299 = vmatpush2.bf16.msra.mxu0 %v4915_v2  ;;  %v5008_v2 = vld [vmem:[%s7374_s2 + $0x524] ss:$16 sps:$4 sm:$0xff]  }
  0x40   :  { %1340 = vmatpush2.bf16.msra.mxu1 %v4916_v3  ;;  %1350 = vmatprep.subr.bf16.mxu0 %v4924_v4  ;;  %v5003_v3 = vld [vmem:[%s7374_s2 + $0x168] ss:$16 sps:$4 sm:$0xff]   ;;  %v5006_v4 = vld [vmem:[%s7374_s2 + $0x520] ss:$16 sps:$4 sm:$0xff]  }
  0x41   :  { %1405 = vmatprep.subr.bf16.mxu1 %v4927_v5  ;;  %v5011_v5 = vld [vmem:[%s7374_s2 + $0x14c] ss:$16 sps:$4 sm:$0xff]  }
  0x42   :  { %1301 = vmatmul.mubr.bf16.vlgmr.msra.gmra.mxu0 %v5887_v6 }
  0x43   :  { %1342 = vmatmul.mubr.bf16.vlgmr.msra.gmra.mxu1 %v5889_v7  ;;  %1351 = vmatpush1.bf16.msra.mxu0 %v4922_v8  ;;  %v5014_v8 = vld [vmem:[%s7374_s2 + $0x504] ss:$16 sps:$4 sm:$0xff]  }
  0x44   :  { %1406 = vmatpush1.bf16.msra.mxu1 %v4925_v9  ;;  %1352 = vmatprep.subr.bf16.mxu0 %v4930_v10  ;;  %v5009_v9 = vld [vmem:[%s7374_s2 + $0x148] ss:$16 sps:$4 sm:$0xff]   ;;  %v5012_v10 = vld [vmem:[%s7374_s2 + $0x500] ss:$16 sps:$4 sm:$0xff]  }
  0x45   :  { %1423 = vmatprep.mubr.bf16.mxu1 %v5616_v13  ;;  %1432 = vmatprep.subr.bf16.mxu1 %v4933_v11  ;;  %v5019_v11 = vld [vmem:[%s7374_s2 + $0x12c] ss:$16 sps:$4 sm:$0xff]  }
  0x46   :  { %1382 = vmatprep.mubr.bf16.mxu0 %v5975_v33 }
  0x47   :  { %1353 = vmatpush1.bf16.msra.mxu0 %v4928_v12  ;;  %v5022_v12 = vld [vmem:[%s7374_s2 + $0x2ec] ss:$16 sps:$4 sm:$0xff]  }
  0x48   :  { %1354 = vmatprep.subr.bf16.mxu0 %v4936_v14  ;;  %v6100_v14 = vcombine.low %v5971_v32, %v5971_v32  ;;  %v5049_v32 = vld [vmem:[%s7374_s2 + $0x48c] ss:$16 sps:$4 sm:$0xff]  }
  0x4b   :  { %4446 = vmatmul.mubr.msk.bf16.vlgmr.msra.gmra.mxu1 %vm1264_vm0, %v5915_v15  ;;  %1355 = vmatpush1.bf16.msra.mxu0 %v4934_v17  ;;  %v5020_v17 = vld [vmem:[%s7374_s2 + $0x2e8] ss:$16 sps:$4 sm:$0xff]  }
  0x4c   :  { %1433 = vmatpush1.bf16.msra.mxu1 %v4931_v16  ;;  %1356 = vmatprep.subr.bf16.mxu0 %v4942_v19  ;;  %v5017_v16 = vld [vmem:[%s7374_s2 + $0x128] ss:$16 sps:$4 sm:$0xff]   ;;  %v5028_v19 = vld [vmem:[%s7374_s2 + $0x2cc] ss:$16 sps:$4 sm:$0xff]  }
  0x4d   :  { %1434 = vmatprep.subr.bf16.mxu1 %v4939_v18  ;;  %1464 = vmatprep.mubr.bf16.mxu1 %v5824_v49  ;;  %v4984_v49 = vld [vmem:[%s7374_s2 + $0x5a4] ss:$16 sps:$4 sm:$0xff]   ;;  %v5025_v18 = vld [vmem:[%s7374_s2 + $0x10c] ss:$16 sps:$4 sm:$0xff]  }
  0x4f   :  { %1357 = vmatpush1.bf16.msra.mxu0 %v4940_v21  ;;  %v5026_v21 = vld [vmem:[%s7374_s2 + $0x2c8] ss:$16 sps:$4 sm:$0xff]  }
  0x50   :  { %1435 = vmatpush1.bf16.msra.mxu1 %v4937_v20  ;;  %1358 = vmatprep.subr.bf16.mxu0 %v4948_v23  ;;  %v5023_v20 = vld [vmem:[%s7374_s2 + $0x108] ss:$16 sps:$4 sm:$0xff]   ;;  %v5034_v23 = vld [vmem:[%s7374_s2 + $0x2ac] ss:$16 sps:$4 sm:$0xff]  }
  0x51   :  { %1436 = vmatprep.subr.bf16.mxu1 %v4945_v22  ;;  %v5031_v22 = vld [vmem:[%s7374_s2 + $0x4ec] ss:$16 sps:$4 sm:$0xff]  }
  0x53   :  { %1359 = vmatpush1.bf16.msra.mxu0 %v4946_v25  ;;  %v5032_v25 = vld [vmem:[%s7374_s2 + $0x2a8] ss:$16 sps:$4 sm:$0xff]  }
  0x54   :  { %1437 = vmatpush1.bf16.msra.mxu1 %v4943_v24  ;;  %1360 = vmatprep.subr.bf16.mxu0 %v4954_v27  ;;  %v5029_v24 = vld [vmem:[%s7374_s2 + $0x4e8] ss:$16 sps:$4 sm:$0xff]  }
  0x55   :  { %1438 = vmatprep.subr.bf16.mxu1 %v4951_v26  ;;  %v5037_v26 = vld [vmem:[%s7374_s2 + $0x4cc] ss:$16 sps:$4 sm:$0xff]   ;;  %v5035_v27 = vld [vmem:[%s7374_s2 + $0x4c8] ss:$16 sps:$4 sm:$0xff]  }
  0x57   :  { %1361 = vmatpush1.bf16.msra.mxu0 %v4952_v29  ;;  %v5043_v29 = vld [vmem:[%s7374_s2 + $0x4ac] ss:$16 sps:$4 sm:$0xff]  }
  0x58   :  { %1439 = vmatpush1.bf16.msra.mxu1 %v4949_v28  ;;  %1362 = vmatprep.subr.bf16.mxu0 %v4960_v31  ;;  %v5038_v28 = vld [vmem:[%s7374_s2 + $0x288] ss:$16 sps:$4 sm:$0xff]  }
  0x59   :  { %1440 = vmatprep.subr.bf16.mxu1 %v4957_v30  ;;  %v5041_v30 = vld [vmem:[%s7374_s2 + $0x4a8] ss:$16 sps:$4 sm:$0xff]  }
  0x5a   :  { %v5044_v31 = vld [vmem:[%s7374_s2 + $0x268] ss:$16 sps:$4 sm:$0xff]  }
  0x5b   :  { %1363 = vmatpush1.bf16.msra.mxu0 %v4958_v35  ;;  %v5050_v35 = vld [vmem:[%s7374_s2 + $0x248] ss:$16 sps:$4 sm:$0xff]  }
  0x5c   :  { %1441 = vmatpush1.bf16.msra.mxu1 %v4955_v34  ;;  %1364 = vmatprep.subr.bf16.mxu0 %v4966_v37  ;;  %v5052_v34 = vld [vmem:[%s7374_s2 + $0x24c] ss:$16 sps:$4 sm:$0xff]  }
  0x5d   :  { %1442 = vmatprep.subr.bf16.mxu1 %v4963_v36  ;;  %v5055_v36 = vld [vmem:[%s7374_s2 + $0x46c] ss:$16 sps:$4 sm:$0xff]  }
  0x5e   :  { %v5058_v37 = vld [vmem:[%s7374_s2 + $0x22c] ss:$16 sps:$4 sm:$0xff]  }
  0x5f   :  { %1365 = vmatpush1.bf16.msra.mxu0 %v4964_v39  ;;  %v5056_v39 = vld [vmem:[%s7374_s2 + $0x228] ss:$16 sps:$4 sm:$0xff]  }
  0x60   :  { %1443 = vmatpush1.bf16.msra.mxu1 %v4961_v38  ;;  %1366 = vmatprep.subr.bf16.mxu0 %v4972_v41  ;;  %v5053_v38 = vld [vmem:[%s7374_s2 + $0x468] ss:$16 sps:$4 sm:$0xff]   ;;  %v5064_v41 = vld [vmem:[%s7374_s2 + $0x20c] ss:$16 sps:$4 sm:$0xff]  }
  0x61   :  { %1444 = vmatprep.subr.bf16.mxu1 %v4969_v40  ;;  %v5061_v40 = vld [vmem:[%s7374_s2 + $0x44c] ss:$16 sps:$4 sm:$0xff]  }
  0x63   :  { %1367 = vmatpush2.bf16.msra.mxu0 %v4970_v43  ;;  %v5062_v43 = vld [vmem:[%s7374_s2 + $0x208] ss:$16 sps:$4 sm:$0xff]  }
  0x64   :  { %1445 = vmatpush1.bf16.msra.mxu1 %v4967_v42  ;;  %1368 = vmatprep.subr.bf16.mxu0 %v4978_v45  ;;  %v5059_v42 = vld [vmem:[%s7374_s2 + $0x448] ss:$16 sps:$4 sm:$0xff]   ;;  %v5070_v45 = vld [vmem:[%s7374_s2 + $0x3ec] ss:$16 sps:$4 sm:$0xff]  }
  0x65   :  { %1446 = vmatprep.subr.bf16.mxu1 %v4975_v44  ;;  %v5067_v44 = vld [vmem:[%s7374_s2 + $0x42c] ss:$16 sps:$4 sm:$0xff]  }
  0x67   :  { %1369 = vmatpush2.bf16.msra.mxu0 %v4976_v47  ;;  %v5068_v47 = vld [vmem:[%s7374_s2 + $0x3e8] ss:$16 sps:$4 sm:$0xff]  }
  0x68   :  { %1447 = vmatpush1.bf16.msra.mxu1 %v4973_v46  ;;  %1370 = vmatprep.subr.bf16.mxu0 %v4984_v49  ;;  %v5065_v46 = vld [vmem:[%s7374_s2 + $0x428] ss:$16 sps:$4 sm:$0xff]   ;;  %v5076_v49 = vld [vmem:[%s7374_s2 + $0x3cc] ss:$16 sps:$4 sm:$0xff]  }
  0x69   :  { %1448 = vmatprep.subr.bf16.mxu1 %v4981_v48  ;;  %v5073_v48 = vld [vmem:[%s7374_s2 + $0x40c] ss:$16 sps:$4 sm:$0xff]  }
  0x6b   :  { %1371 = vmatpush2.bf16.msra.mxu0 %v4982_v51  ;;  %v5074_v51 = vld [vmem:[%s7374_s2 + $0x3c8] ss:$16 sps:$4 sm:$0xff]  }
  0x6c   :  { %1449 = vmatpush2.bf16.msra.mxu1 %v4979_v50  ;;  %1372 = vmatprep.subr.bf16.mxu0 %v4990_v54  ;;  %v5071_v50 = vld [vmem:[%s7374_s2 + $0x408] ss:$16 sps:$4 sm:$0xff]   ;;  %v5082_v54 = vld [vmem:[%s7374_s2 + $0x3ac] ss:$16 sps:$4 sm:$0xff]  }
  0x6d   :  { %1450 = vmatprep.subr.bf16.mxu1 %v4987_v53  ;;  %v5079_v53 = vld [vmem:[%s7374_s2 + $0x5ec] ss:$16 sps:$4 sm:$0xff]  }
  0x6f   :  { %1373 = vmatpush2.bf16.msra.mxu0 %v4988_v56  ;;  %v5080_v56 = vld [vmem:[%s7374_s2 + $0x3a8] ss:$16 sps:$4 sm:$0xff]  }
  0x70   :  { %1451 = vmatpush2.bf16.msra.mxu1 %v4985_v55  ;;  %1374 = vmatprep.subr.bf16.mxu0 %v4996_v58  ;;  %v5077_v55 = vld [vmem:[%s7374_s2 + $0x5e8] ss:$16 sps:$4 sm:$0xff]   ;;  %v5088_v58 = vld [vmem:[%s7374_s2 + $0x38c] ss:$16 sps:$4 sm:$0xff]  }
  0x71   :  { %1452 = vmatprep.subr.bf16.mxu1 %v4993_v57  ;;  %v5085_v57 = vld [vmem:[%s7374_s2 + $0x5cc] ss:$16 sps:$4 sm:$0xff]  }
  0x73   :  { %1375 = vmatpush2.bf16.msra.mxu0 %v4994_v60  ;;  %v5086_v60 = vld [vmem:[%s7374_s2 + $0x388] ss:$16 sps:$4 sm:$0xff]  }
  0x74   :  { %1453 = vmatpush2.bf16.msra.mxu1 %v4991_v59  ;;  %1376 = vmatprep.subr.bf16.mxu0 %v5002_v62  ;;  %v5083_v59 = vld [vmem:[%s7374_s2 + $0x5c8] ss:$16 sps:$4 sm:$0xff]   ;;  %v5094_v62 = vld [vmem:[%s7374_s2 + $0x36c] ss:$16 sps:$4 sm:$0xff]  }
  0x75   :  { %1454 = vmatprep.subr.bf16.mxu1 %v4999_v61  ;;  %v5091_v61 = vld [vmem:[%s7374_s2 + $0x5ac] ss:$16 sps:$4 sm:$0xff]  }
  0x77   :  { %1377 = vmatpush2.bf16.msra.mxu0 %v5000_v0  ;;  %v5092_v0 = vld [vmem:[%s7374_s2 + $0x368] ss:$16 sps:$4 sm:$0xff]  }
  0x78   :  { %1455 = vmatpush2.bf16.msra.mxu1 %v4997_v63  ;;  %1378 = vmatprep.subr.bf16.mxu0 %v5008_v2  ;;  %v5089_v63 = vld [vmem:[%s7374_s2 + $0x5a8] ss:$16 sps:$4 sm:$0xff]   ;;  %v5100_v2 = vld [vmem:[%s7374_s2 + $0x34c] ss:$16 sps:$4 sm:$0xff]  }
  0x79   :  { %1456 = vmatprep.subr.bf16.mxu1 %v5005_v1  ;;  %v5097_v1 = vld [vmem:[%s7374_s2 + $0x58c] ss:$16 sps:$4 sm:$0xff]  }
  0x7b   :  { %1379 = vmatpush2.bf16.msra.mxu0 %v5006_v4  ;;  %v5098_v4 = vld [vmem:[%s7374_s2 + $0x348] ss:$16 sps:$4 sm:$0xff]  }
  0x7c   :  { %1457 = vmatpush2.bf16.msra.mxu1 %v5003_v3  ;;  %1380 = vmatprep.subr.bf16.mxu0 %v5014_v8  ;;  %v5095_v3 = vld [vmem:[%s7374_s2 + $0x588] ss:$16 sps:$4 sm:$0xff]   ;;  %v5106_v8 = vld [vmem:[%s7374_s2 + $0x32c] ss:$16 sps:$4 sm:$0xff]  }
  0x7d   :  { %1458 = vmatprep.subr.bf16.mxu1 %v5011_v5  ;;  %v5103_v5 = vld [vmem:[%s7374_s2 + $0x56c] ss:$16 sps:$4 sm:$0xff]  }
  0x7f   :  { %1381 = vmatpush2.bf16.msra.mxu0 %v5012_v10  ;;  %v5104_v10 = vld [vmem:[%s7374_s2 + $0x328] ss:$16 sps:$4 sm:$0xff]  }
  0x80   :  { %1459 = vmatpush2.bf16.msra.mxu1 %v5009_v9  ;;  %1473 = vmatprep.subr.bf16.mxu0 %v5022_v12  ;;  %v5101_v9 = vld [vmem:[%s7374_s2 + $0x568] ss:$16 sps:$4 sm:$0xff]   ;;  %v5112_v12 = vld [vmem:[%s7374_s2 + $0x30c] ss:$16 sps:$4 sm:$0xff]  }
  0x81   :  { %1460 = vmatprep.subr.bf16.mxu1 %v5019_v11  ;;  %v5109_v11 = vld [vmem:[%s7374_s2 + $0x54c] ss:$16 sps:$4 sm:$0xff]  }
  0x82   :  { %1383 = vmatmul.mubr.bf16.vlgmr.msra.gmra.mxu0 %v6100_v14 }
  0x83   :  { %1474 = vmatpush1.bf16.msra.mxu0 %v5020_v17  ;;  %1505 = vmatprep.mubr.bf16.mxu0 %v5832_v52  ;;  %v5040_v52 = vld [vmem:[%s7374_s2 + $0x28c] ss:$16 sps:$4 sm:$0xff]   ;;  %v5110_v17 = vld [vmem:[%s7374_s2 + $0x308] ss:$16 sps:$4 sm:$0xff]  }
  0x84   :  { %1461 = vmatpush2.bf16.msra.mxu1 %v5017_v16  ;;  %1475 = vmatprep.subr.bf16.mxu0 %v5028_v19  ;;  %v5107_v16 = vld [vmem:[%s7374_s2 + $0x548] ss:$16 sps:$4 sm:$0xff]   ;;  %v5118_v19 = vld [vmem:[%s7374_s2 + $0x60c] ss:$16 sps:$4 sm:$0xff]  }
  0x85   :  { %1462 = vmatprep.subr.bf16.mxu1 %v5025_v18  ;;  %v5115_v18 = vld [vmem:[%s7374_s2 + $0x52c] ss:$16 sps:$4 sm:$0xff]  }
  0x87   :  { %1476 = vmatpush1.bf16.msra.mxu0 %v5026_v21  ;;  %v5116_v21 = vld [vmem:[%s7374_s2 + $0x608] ss:$16 sps:$4 sm:$0xff]  }
  0x88   :  { %1463 = vmatpush2.bf16.msra.mxu1 %v5023_v20  ;;  %1477 = vmatprep.subr.bf16.mxu0 %v5034_v23  ;;  %v5113_v20 = vld [vmem:[%s7374_s2 + $0x528] ss:$16 sps:$4 sm:$0xff]   ;;  %v5124_v23 = vld [vmem:[%s7376_s4 + $0x74] ss:$8 sps:$4 sm:$0xff]  }
  0x89   :  { %1514 = vmatprep.subr.bf16.mxu1 %v5031_v22  ;;  %v5121_v22 = vld [vmem:[%s7374_s2 + $0x50c] ss:$16 sps:$4 sm:$0xff]  }
  0x8b   :  { %1465 = vmatmul.mubr.bf16.vlgmr.msra.gmra.mxu1 %v5887_v6  ;;  %1478 = vmatpush1.bf16.msra.mxu0 %v5032_v25  ;;  %v5046_v6 = vld [vmem:[%s7374_s2 + $0x26c] ss:$16 sps:$4 sm:$0xff]   ;;  %v5122_v25 = vld [vmem:[%s7376_s4 + $0x70] ss:$8 sps:$4 sm:$0xff]  }
  0x8c   :  { %1515 = vmatpush1.bf16.msra.mxu1 %v5029_v24  ;;  %1479 = vmatprep.subr.bf16.mxu0 %v5040_v52  ;;  %v5119_v24 = vld [vmem:[%s7374_s2 + $0x508] ss:$16 sps:$4 sm:$0xff]   ;;  %v5130_v52 = vld [vmem:[%s7376_s4 + $0x54] ss:$8 sps:$4 sm:$0xff]  }
  0x8d   :  { %1516 = vmatprep.subr.bf16.mxu1 %v5037_v26  ;;  %1546 = vmatprep.mubr.bf16.mxu1 %v5975_v33  ;;  %v5047_v33 = vld [vmem:[%s7374_s2 + $0x488] ss:$16 sps:$4 sm:$0xff]   ;;  %v5127_v26 = vld [vmem:[%s7376_s4 + $0x64] ss:$8 sps:$4 sm:$0xff]  }
  0x8f   :  { %1480 = vmatpush1.bf16.msra.mxu0 %v5038_v28  ;;  %v5172_v28 = vld [vmem:[%s7376_s4 + $0x174] ss:$8 sps:$4 sm:$0xff]  }
  0x90   :  { %1517 = vmatpush1.bf16.msra.mxu1 %v5035_v27  ;;  %1481 = vmatprep.subr.bf16.mxu0 %v5046_v6  ;;  %v5128_v27 = vld [vmem:[%s7376_s4 + $0x50] ss:$8 sps:$4 sm:$0xff]   ;;  %v5131_v6 = vld [vmem:[%s7376_s4 + $0x40] ss:$8 sps:$4 sm:$0xff]  }
  0x91   :  { %1518 = vmatprep.subr.bf16.mxu1 %v5043_v29  ;;  %v5175_v29 = vld [vmem:[%s7376_s4 + $0x164] ss:$8 sps:$4 sm:$0xff]  }
  0x93   :  { %1482 = vmatpush1.bf16.msra.mxu0 %v5044_v31  ;;  %v5136_v31 = vld [vmem:[%s7376_s4 + $0x34] ss:$8 sps:$4 sm:$0xff]  }
  0x94   :  { %1519 = vmatpush1.bf16.msra.mxu1 %v5041_v30  ;;  %1483 = vmatprep.subr.bf16.mxu0 %v5052_v34  ;;  %v5173_v30 = vld [vmem:[%s7376_s4 + $0x160] ss:$8 sps:$4 sm:$0xff]   ;;  %v5134_v34 = vld [vmem:[%s7376_s4 + $0x30] ss:$8 sps:$4 sm:$0xff]  }
  0x95   :  { %1520 = vmatprep.subr.bf16.mxu1 %v5049_v32  ;;  %v5178_v32 = vld [vmem:[%s7376_s4 + $0x154] ss:$8 sps:$4 sm:$0xff]  }
  0x97   :  { %1484 = vmatpush1.bf16.msra.mxu0 %v5050_v35  ;;  %v5139_v35 = vld [vmem:[%s7376_s4 + $0x24] ss:$8 sps:$4 sm:$0xff]  }
  0x98   :  { %1521 = vmatpush1.bf16.msra.mxu1 %v5047_v33  ;;  %1485 = vmatprep.subr.bf16.mxu0 %v5058_v37  ;;  %v5176_v33 = vld [vmem:[%s7376_s4 + $0x150] ss:$8 sps:$4 sm:$0xff]   ;;  %v5137_v37 = vld [vmem:[%s7376_s4 + $0x20] ss:$8 sps:$4 sm:$0xff]  }
  0x99   :  { %1522 = vmatprep.subr.bf16.mxu1 %v5055_v36  ;;  %v5181_v36 = vld [vmem:[%s7376_s4 + $0x144] ss:$8 sps:$4 sm:$0xff]  }
  0x9b   :  { %1486 = vmatpush1.bf16.msra.mxu0 %v5056_v39  ;;  %v5142_v39 = vld [vmem:[%s7376_s4 + $0x14] ss:$8 sps:$4 sm:$0xff]  }
  0x9c   :  { %1523 = vmatpush1.bf16.msra.mxu1 %v5053_v38  ;;  %1487 = vmatprep.subr.bf16.mxu0 %v5064_v41  ;;  %v5179_v38 = vld [vmem:[%s7376_s4 + $0x140] ss:$8 sps:$4 sm:$0xff]   ;;  %v5140_v41 = vld [vmem:[%s7376_s4 + $0x10] ss:$8 sps:$4 sm:$0xff]  }
  0x9d   :  { %1524 = vmatprep.subr.bf16.mxu1 %v5061_v40  ;;  %v5184_v40 = vld [vmem:[%s7376_s4 + $0x134] ss:$8 sps:$4 sm:$0xff]  }
  0x9f   :  { %1488 = vmatpush1.bf16.msra.mxu0 %v5062_v43  ;;  %v5145_v43 = vld [vmem:[%s7376_s4 + $0x4] ss:$8 sps:$4 sm:$0xff]  }
  0xa0   :  { %1525 = vmatpush1.bf16.msra.mxu1 %v5059_v42  ;;  %1489 = vmatprep.subr.bf16.mxu0 %v5070_v45  ;;  %v5182_v42 = vld [vmem:[%s7376_s4 + $0x130] ss:$8 sps:$4 sm:$0xff]   ;;  %v5143_v45 = vld [vmem:[%s7376_s4] ss:$8 sps:$4 sm:$0xff]  }
  0xa1   :  { %1526 = vmatprep.subr.bf16.mxu1 %v5067_v44  ;;  %v5187_v44 = vld [vmem:[%s7376_s4 + $0x124] ss:$8 sps:$4 sm:$0xff]  }
  0xa3   :  { %1490 = vmatpush2.bf16.msra.mxu0 %v5068_v47  ;;  %v5148_v47 = vld [vmem:[%s7376_s4 + $0xf4] ss:$8 sps:$4 sm:$0xff]  }
  0xa4   :  { %1527 = vmatpush1.bf16.msra.mxu1 %v5065_v46  ;;  %1491 = vmatprep.subr.bf16.mxu0 %v5076_v49  ;;  %v5185_v46 = vld [vmem:[%s7376_s4 + $0x120] ss:$8 sps:$4 sm:$0xff]   ;;  %v5146_v49 = vld [vmem:[%s7376_s4 + $0xf0] ss:$8 sps:$4 sm:$0xff]  }
  0xa5   :  { %1528 = vmatprep.subr.bf16.mxu1 %v5073_v48  ;;  %v5190_v48 = vld [vmem:[%s7376_s4 + $0x114] ss:$8 sps:$4 sm:$0xff]  }
  0xa7   :  { %1492 = vmatpush2.bf16.msra.mxu0 %v5074_v51  ;;  %v5151_v51 = vld [vmem:[%s7376_s4 + $0xe4] ss:$8 sps:$4 sm:$0xff]  }
  0xa8   :  { %1529 = vmatpush1.bf16.msra.mxu1 %v5071_v50  ;;  %1493 = vmatprep.subr.bf16.mxu0 %v5082_v54  ;;  %v5188_v50 = vld [vmem:[%s7376_s4 + $0x110] ss:$8 sps:$4 sm:$0xff]   ;;  %v5149_v54 = vld [vmem:[%s7376_s4 + $0xe0] ss:$8 sps:$4 sm:$0xff]  }
  0xa9   :  { %1530 = vmatprep.subr.bf16.mxu1 %v5079_v53  ;;  %v5193_v53 = vld [vmem:[%s7376_s4 + $0x104] ss:$8 sps:$4 sm:$0xff]  }
  0xab   :  { %1494 = vmatpush2.bf16.msra.mxu0 %v5080_v56  ;;  %v5154_v56 = vld [vmem:[%s7376_s4 + $0xd4] ss:$8 sps:$4 sm:$0xff]  }
  0xac   :  { %1531 = vmatpush2.bf16.msra.mxu1 %v5077_v55  ;;  %1495 = vmatprep.subr.bf16.mxu0 %v5088_v58  ;;  %v5191_v55 = vld [vmem:[%s7376_s4 + $0x100] ss:$8 sps:$4 sm:$0xff]   ;;  %v5152_v58 = vld [vmem:[%s7376_s4 + $0xd0] ss:$8 sps:$4 sm:$0xff]  }
  0xad   :  { %1532 = vmatprep.subr.bf16.mxu1 %v5085_v57  ;;  %v5196_v57 = vld [vmem:[%s7376_s4 + $0x1f4] ss:$8 sps:$4 sm:$0xff]  }
  0xaf   :  { %1496 = vmatpush2.bf16.msra.mxu0 %v5086_v60  ;;  %v5157_v60 = vld [vmem:[%s7376_s4 + $0xc4] ss:$8 sps:$4 sm:$0xff]  }
  0xb0   :  { %1533 = vmatpush2.bf16.msra.mxu1 %v5083_v59  ;;  %1497 = vmatprep.subr.bf16.mxu0 %v5094_v62  ;;  %v5194_v59 = vld [vmem:[%s7376_s4 + $0x1f0] ss:$8 sps:$4 sm:$0xff]   ;;  %v5155_v62 = vld [vmem:[%s7376_s4 + $0xc0] ss:$8 sps:$4 sm:$0xff]  }
  0xb1   :  { %1534 = vmatprep.subr.bf16.mxu1 %v5091_v61  ;;  %v5199_v61 = vld [vmem:[%s7376_s4 + $0x1e4] ss:$8 sps:$4 sm:$0xff]  }
  0xb3   :  { %1498 = vmatpush2.bf16.msra.mxu0 %v5092_v0  ;;  %v5160_v0 = vld [vmem:[%s7376_s4 + $0xb4] ss:$8 sps:$4 sm:$0xff]  }
  0xb4   :  { %1535 = vmatpush2.bf16.msra.mxu1 %v5089_v63  ;;  %1499 = vmatprep.subr.bf16.mxu0 %v5100_v2  ;;  %v5197_v63 = vld [vmem:[%s7376_s4 + $0x1e0] ss:$8 sps:$4 sm:$0xff]   ;;  %v5158_v2 = vld [vmem:[%s7376_s4 + $0xb0] ss:$8 sps:$4 sm:$0xff]  }
  0xb5   :  { %1536 = vmatprep.subr.bf16.mxu1 %v5097_v1  ;;  %v5202_v1 = vld [vmem:[%s7376_s4 + $0x1d4] ss:$8 sps:$4 sm:$0xff]  }
  0xb7   :  { %1500 = vmatpush2.bf16.msra.mxu0 %v5098_v4  ;;  %v5163_v4 = vld [vmem:[%s7376_s4 + $0xa4] ss:$8 sps:$4 sm:$0xff]  }
  0xb8   :  { %1537 = vmatpush2.bf16.msra.mxu1 %v5095_v3  ;;  %1501 = vmatprep.subr.bf16.mxu0 %v5106_v8  ;;  %v5200_v3 = vld [vmem:[%s7376_s4 + $0x1d0] ss:$8 sps:$4 sm:$0xff]   ;;  %v5161_v8 = vld [vmem:[%s7376_s4 + $0xa0] ss:$8 sps:$4 sm:$0xff]  }
  0xb9   :  { %1538 = vmatprep.subr.bf16.mxu1 %v5103_v5  ;;  %v5205_v5 = vld [vmem:[%s7376_s4 + $0x1c4] ss:$8 sps:$4 sm:$0xff]  }
  0xbb   :  { %1502 = vmatpush2.bf16.msra.mxu0 %v5104_v10  ;;  %v5166_v10 = vld [vmem:[%s7376_s4 + $0x94] ss:$8 sps:$4 sm:$0xff]  }
  0xbc   :  { %1539 = vmatpush2.bf16.msra.mxu1 %v5101_v9  ;;  %1503 = vmatprep.subr.bf16.mxu0 %v5112_v12  ;;  %v5203_v9 = vld [vmem:[%s7376_s4 + $0x1c0] ss:$8 sps:$4 sm:$0xff]   ;;  %v5169_v12 = vld [vmem:[%s7376_s4 + $0x84] ss:$8 sps:$4 sm:$0xff]  }
  0xbd   :  { %1540 = vmatprep.subr.bf16.mxu1 %v5109_v11  ;;  %v5164_v11 = vld [vmem:[%s7376_s4 + $0x90] ss:$8 sps:$4 sm:$0xff]  }
  0xbf   :  { %1504 = vmatpush2.bf16.msra.mxu0 %v5110_v17 }
  0xc0   :  { %1541 = vmatpush2.bf16.msra.mxu1 %v5107_v16  ;;  %1569 = vmatprep.subr.bf16.mxu0 %v5118_v19 }
  0xc1   :  { %1542 = vmatprep.subr.bf16.mxu1 %v5115_v18  ;;  %v5167_v18 = vld [vmem:[%s7376_s4 + $0x80] ss:$8 sps:$4 sm:$0xff]  }
  0xc2   :  { %1506 = vmatmul.mubr.bf16.vlgmr.msra.gmra.mxu0 %v5889_v7  ;;  %v5125_v7 = vld [vmem:[%s7376_s4 + $0x60] ss:$8 sps:$4 sm:$0xff]  }
  0xc3   :  { %1570 = vmatpush1.bf16.msra.mxu0 %v5116_v21  ;;  %1587 = vmatprep.mubr.bf16.mxu0 %v5616_v13  ;;  %v5208_v21 = vld [vmem:[%s7376_s4 + $0x1b4] ss:$8 sps:$4 sm:$0xff]  }
  0xc4   :  { %1543 = vmatpush2.bf16.msra.mxu1 %v5113_v20  ;;  %2000 = vmatprep.subr.bf16.mxu0 %v5124_v23 }
  0xc5   :  { %1544 = vmatprep.subr.bf16.mxu1 %v5121_v22  ;;  %v5206_v22 = vld [vmem:[%s7376_s4 + $0x1b0] ss:$8 sps:$4 sm:$0xff]  }
  0xc8   :  { %1545 = vmatpush2.bf16.msra.mxu1 %v5119_v24 }
  0xc9   :  { %2041 = vmatprep.subr.bf16.mxu1 %v5172_v28  ;;  %v5212_v28 = vld [vmem:[%s7376_s4 + $0x190] ss:$8 sps:$4 sm:$0xff]  }
  0xca   :  { %4447 = vmatmul.mubr.msk.bf16.vlgmr.msra.gmra.mxu0 %vm1264_vm0, %v5915_v15  ;;  %v5133_v15 = vld [vmem:[%s7376_s4 + $0x44] ss:$8 sps:$4 sm:$0xff]  }
  0xcb   :  { %1547 = vmatmul.mubr.bf16.vlgmr.msra.gmra.mxu1 %v6100_v14  ;;  %2001 = vmatpush1.bf16.msra.mxu0 %v5122_v25  ;;  %v5170_v14 = vld [vmem:[%s7376_s4 + $0x170] ss:$8 sps:$4 sm:$0xff]  }
  0xcc   :  { %2002 = vmatprep.subr.bf16.mxu0 %v5127_v26  ;;  %2042 = vmatpush1.bf16.msra.mxu1 %v5170_v14  ;;  %v5214_v14 = vld [vmem:[%s7376_s4 + $0x194] ss:$8 sps:$4 sm:$0xff]  }
  0xcd   :  { %2043 = vmatprep.subr.bf16.mxu1 %v5175_v29 }
  0xcf   :  { %2003 = vmatpush1.bf16.msra.mxu0 %v5125_v7  ;;  %v5211_v7 = vld [vmem:[%s7376_s4 + $0x1a4] ss:$8 sps:$4 sm:$0xff]  }
  0xd0   :  { %2004 = vmatprep.subr.bf16.mxu0 %v5130_v52  ;;  %2044 = vmatpush1.bf16.msra.mxu1 %v5173_v30  ;;  %v5209_v52 = vld [vmem:[%s7376_s4 + $0x1a0] ss:$8 sps:$4 sm:$0xff]   ;;  %v5217_v30 = vld [vmem:[%s7376_s4 + $0x184] ss:$8 sps:$4 sm:$0xff]  }
  0xd1   :  { %2045 = vmatprep.subr.bf16.mxu1 %v5178_v32  ;;  %v240_v32 = vlaneseq }
  0xd3   :  { %2005 = vmatpush1.bf16.msra.mxu0 %v5128_v27 }
  0xd4   :  { %2006 = vmatprep.subr.bf16.mxu0 %v5133_v15  ;;  %2046 = vmatpush1.bf16.msra.mxu1 %v5176_v33 }
  0xd5   :  { %2047 = vmatprep.subr.bf16.mxu1 %v5181_v36 }
  0xd7   :  { %2007 = vmatpush1.bf16.msra.mxu0 %v5131_v6 }
  0xd8   :  { %2008 = vmatprep.subr.bf16.mxu0 %v5136_v31  ;;  %2048 = vmatpush1.bf16.msra.mxu1 %v5179_v38  ;;  %v5215_v31 = vld [vmem:[%s7376_s4 + $0x180] ss:$8 sps:$4 sm:$0xff]  }
  0xd9   :  { %2049 = vmatprep.subr.bf16.mxu1 %v5184_v40 }
  0xdb   :  { %2009 = vmatpush1.bf16.msra.mxu0 %v5134_v34  ;;  %v6507_v34 = vshrl.u32 %v240_v32, 7  ;;  %v5235_v32 = vld [vmem:[%s7378_s6 + $0xac] ss:$16 sps:$4 sm:$0xff]  }
  0xdc   :  { %2010 = vmatprep.subr.bf16.mxu0 %v5139_v35  ;;  %2050 = vmatpush1.bf16.msra.mxu1 %v5182_v42  ;;  %v238_v35 = vld [vmem:[%s7377_s3] sm:$0xf] }
  0xdd   :  { %2051 = vmatprep.subr.bf16.mxu1 %v5187_v44  ;;  %v6510_v33 = vsub.s32 0, %v6507_v34  ;;  %v6516_v36 = vsub.s32 1, %v6507_v34 }
  0xdf   :  { %2011 = vmatpush1.bf16.msra.mxu0 %v5137_v37  ;;  %v243_v37 = vrot.slane %v238_v35, %v6510_v33  ;;  %v247_v38 = vrot.slane %v238_v35, %v6516_v36 }
  0xe0   :  { %2012 = vmatprep.subr.bf16.mxu0 %v5142_v39  ;;  %2052 = vmatpush1.bf16.msra.mxu1 %v5185_v46 }
  0xe1   :  { %2053 = vmatprep.subr.bf16.mxu1 %v5190_v48 }
  0xe3   :  { %2013 = vmatpush1.bf16.msra.mxu0 %v5140_v41 }
  0xe4   :  { %2014 = vmatprep.subr.bf16.mxu0 %v5145_v43  ;;  %2054 = vmatpush1.bf16.msra.mxu1 %v5188_v50 }
  0xe5   :  { %2055 = vmatprep.subr.bf16.mxu1 %v5193_v53 }
  0xe7   :  { %2015 = vmatpush1.bf16.msra.mxu0 %v5143_v45 }
  0xe8   :  { %2016 = vmatprep.subr.bf16.mxu0 %v5148_v47  ;;  %2056 = vmatpush1.bf16.msra.mxu1 %v5191_v55 }
  0xe9   :  { %2057 = vmatprep.subr.bf16.mxu1 %v5196_v57 }
  0xeb   :  { %2017 = vmatpush2.bf16.msra.mxu0 %v5146_v49 }
  0xec   :  { %2018 = vmatprep.subr.bf16.mxu0 %v5151_v51  ;;  %2058 = vmatpush2.bf16.msra.mxu1 %v5194_v59 }
  0xed   :  { %2059 = vmatprep.subr.bf16.mxu1 %v5199_v61  ;;  %v6525_v61 = vsub.s32 3, %v6507_v34 }
  0xef   :  { %2019 = vmatpush2.bf16.msra.mxu0 %v5149_v54 }
  0xf0   :  { %2020 = vmatprep.subr.bf16.mxu0 %v5154_v56  ;;  %2060 = vmatpush2.bf16.msra.mxu1 %v5197_v63 }
  0xf1   :  { %2061 = vmatprep.subr.bf16.mxu1 %v5202_v1  ;;  %v255_v1 = vrot.slane %v238_v35, %v6525_v61 }
  0xf3   :  { %2021 = vmatpush2.bf16.msra.mxu0 %v5152_v58 }
  0xf4   :  { %2022 = vmatprep.subr.bf16.mxu0 %v5157_v60  ;;  %2062 = vmatpush2.bf16.msra.mxu1 %v5200_v3  ;;  %v6522_v60 = vsub.s32 2, %v6507_v34 }
  0xf5   :  { %2063 = vmatprep.subr.bf16.mxu1 %v5205_v5 }
  0xf6   :  { %v251_v63 = vrot.slane %v238_v35, %v6522_v60  ;;  %v5230_v35 = vld [vmem:[%s7378_s6 + $0xa0] ss:$16 sps:$4 sm:$0xff]  }
  0xf7   :  { %2023 = vmatpush2.bf16.msra.mxu0 %v5155_v62 }
  0xf8   :  { %2024 = vmatprep.subr.bf16.mxu0 %v5160_v0  ;;  %2064 = vmatpush2.bf16.msra.mxu1 %v5203_v9 }
  0xf9   :  { %2065 = vmatprep.subr.bf16.mxu1 %v5208_v21 }
  0xfb   :  { %2025 = vmatpush2.bf16.msra.mxu0 %v5158_v2 }
  0xfc   :  { %2026 = vmatprep.subr.bf16.mxu0 %v5163_v4  ;;  %2066 = vmatpush2.bf16.msra.mxu1 %v5206_v22 }
  0xfd   :  { %2067 = vmatprep.subr.bf16.mxu1 %v5211_v7 }
  0xff   :  { %2027 = vmatpush2.bf16.msra.mxu0 %v5161_v8 }
 0x100   :  { %2028 = vmatprep.subr.bf16.mxu0 %v5166_v10  ;;  %2068 = vmatpush2.bf16.msra.mxu1 %v5209_v52 }
 0x101   :  { %2069 = vmatprep.subr.bf16.mxu1 %v5214_v14  ;;  %v5221_v14 = vld [vmem:[%s7378_s6 + $0xe8] ss:$16 sps:$4 sm:$0xff]  }
 0x102   :  { %v1302_v16 = vpop.f32.mrf.mxu0 }
 0x103   :  { %v1343_v17 = vpop.f32.mrf.mxu1  ;;  %2029 = vmatpush2.bf16.msra.mxu0 %v5164_v11  ;;  %v1303_v39 = vadd.f32 %v1302_v16, %v243_v37  ;;  %v5233_v37 = vld [vmem:[%s7378_s6 + $0xa8] ss:$16 sps:$4 sm:$0xff]  }
 0x104   :  { %v1304_v19 = vpop.f32.mrf.mxu0  ;;  %2030 = vmatprep.subr.bf16.mxu0 %v5169_v12  ;;  %2070 = vmatpush2.bf16.msra.mxu1 %v5212_v28  ;;  %v5223_v28 = vld [vmem:[%s7378_s6 + $0xec] ss:$16 sps:$4 sm:$0xff]  }
 0x105   :  { %v1345_v20 = vpop.f32.mrf.mxu1  ;;  %2071 = vmatprep.subr.bf16.mxu1 %v5217_v30  ;;  %v1305_v40 = vadd.f32 %v1304_v19, %v247_v38  ;;  %v1344_v41 = vadd.f32 %v1343_v17, %v1303_v39  ;;  %v5224_v30 = vld [vmem:[%s7378_s6 + $0xc0] ss:$16 sps:$4 sm:$0xff]   ;;  %v5238_v38 = vld [vmem:[%s7378_s6 + $0x84] ss:$16 sps:$4 sm:$0xff]   ;;  %v5241_v39 = vld [vmem:[%s7378_s6 + $0x8c] ss:$16 sps:$4 sm:$0xff]  }
 0x106   :  { %v1306_v23 = vpop.f32.mrf.mxu0 }
 0x107   :  { %v1347_v24 = vpop.f32.mrf.mxu1  ;;  %2031 = vmatpush2.bf16.msra.mxu0 %v5167_v18  ;;  %v1346_v43 = vadd.f32 %v1345_v20, %v1305_v40  ;;  %v5236_v40 = vld [vmem:[%s7378_s6 + $0x80] ss:$16 sps:$4 sm:$0xff]  }
 0x108   :  { %v1307_v25 = vpop.f32.mrf.mxu0  ;;  %2072 = vmatpush2.bf16.msra.mxu1 %v5215_v31  ;;  %v5232_v31 = vld [vmem:[%s7378_s6 + $0xa4] ss:$16 sps:$4 sm:$0xff]  }
 0x109   :  { %v1348_v26 = vpop.f32.mrf.mxu1  ;;  %2346 = vmatprep.subr.bf16.mxu1 %v5223_v28  ;;  %v5280_v28 = vld [vmem:[%s7379_s8 + $0x11c] ss:$28 sps:$4 sm:$0xff]  }
 0x10b   :  { %v1425_v27 = vpop.f32.mrf.mxu1 }
 0x10d   :  { %v1427_v15 = vpop.f32.mrf.mxu1 }
 0x10f   :  { %v1429_v29 = vpop.f32.mrf.mxu1 }
 0x110   :  { %v5226_v29 = vld [vmem:[%s7378_s6 + $0xc4] ss:$16 sps:$4 sm:$0xff]  }
 0x111   :  { %v1430_v6 = vpop.f32.mrf.mxu1 }
 0x112   :  { %v5229_v6 = vld [vmem:[%s7378_s6 + $0xcc] ss:$16 sps:$4 sm:$0xff]  }
 0x142   :  { %v1384_v42 = vpop.f32.mrf.mxu0 }
 0x143   :  { %v1385_v44 = vadd.f32 %v1384_v42, %v1344_v41  ;;  %v5239_v41 = vld [vmem:[%s7378_s6 + $0x88] ss:$16 sps:$4 sm:$0xff]   ;;  %v5244_v42 = vld [vmem:[%s7378_s6 + $0x64] ss:$16 sps:$4 sm:$0xff]  }
 0x144   :  { %v1386_v45 = vpop.f32.mrf.mxu0 }
 0x145   :  { %v1426_v46 = vadd.f32 %v1425_v27, %v1385_v44  ;;  %v1387_v47 = vadd.f32 %v1386_v45, %v1346_v43  ;;  %v5218_v27 = vld [vmem:[%s7378_s6 + $0xe0] ss:$16 sps:$4 sm:$0xff]   ;;  %v5245_v44 = vld [vmem:[%s7378_s6 + $0x68] ss:$16 sps:$4 sm:$0xff]   ;;  %v5247_v45 = vld [vmem:[%s7378_s6 + $0x6c] ss:$16 sps:$4 sm:$0xff]  }
 0x146   :  { %v1388_v48 = vpop.f32.mrf.mxu0  ;;  %v5242_v43 = vld [vmem:[%s7378_s6 + $0x60] ss:$16 sps:$4 sm:$0xff]  }
 0x147   :  { %v1428_v49 = vadd.f32 %v1427_v15, %v1387_v47  ;;  %v1596_v50 = vmax.f32 %v1426_v46, 0.0  ;;  %v5220_v15 = vld [vmem:[%s7378_s6 + $0xe4] ss:$16 sps:$4 sm:$0xff]   ;;  %v5253_v47 = vld [vmem:[%s7378_s6 + $0x4c] ss:$16 sps:$4 sm:$0xff]  }
 0x148   :  { %v1389_v51 = vpop.f32.mrf.mxu0  ;;  %2305 = vmatprep.subr.bf16.mxu0 %v5220_v15  ;;  %v5250_v46 = vld [vmem:[%s7378_s6 + $0x44] ss:$16 sps:$4 sm:$0xff]   ;;  %v5248_v48 = vld [vmem:[%s7378_s6 + $0x40] ss:$16 sps:$4 sm:$0xff]  }
 0x149   :  { %v1597_v53 = vmax.f32 %v1428_v49, 0.0  ;;  %v1600_v56 = vpack.c.bf16 %v1596_v50, %v1596_v50  ;;  %v5251_v49 = vld [vmem:[%s7378_s6 + $0x48] ss:$16 sps:$4 sm:$0xff]   ;;  %v5256_v50 = vld [vmem:[%s7378_s6 + $0x24] ss:$16 sps:$4 sm:$0xff]  }
 0x14a   :  { %v5259_v51 = vld [vmem:[%s7378_s6 + $0x2c] ss:$16 sps:$4 sm:$0xff]  }
 0x14b   :  { %v1466_v54 = vpop.f32.mrf.mxu1  ;;  %v1601_v55 = vpack.c.bf16 %v1597_v53, %v1597_v53  ;;  %v5254_v53 = vld [vmem:[%s7378_s6 + $0x20] ss:$16 sps:$4 sm:$0xff]  }
 0x14c   :  { %v1467_v3 = vadd.f32 %v1466_v54, %v251_v63  ;;  %v5257_v54 = vld [vmem:[%s7378_s6 + $0x28] ss:$16 sps:$4 sm:$0xff]   ;;  %v5272_v15 = vld [vmem:[%s7379_s8 + $0x150] ss:$28 sps:$4 sm:$0xff]  }
 0x14d   :  { %v1468_v57 = vpop.f32.mrf.mxu1  ;;  %2032 = vmatprep.mubr.bf16.mxu0 %v1601_v55  ;;  %v5262_v55 = vld [vmem:[%s7378_s6 + $0x4] ss:$16 sps:$4 sm:$0xff]  }
 0x14e   :  { %2033 = vmatmul.mubr.bf16.vlgmr.msra.gmra.mxu0 %v1600_v56  ;;  %v1469_v5 = vadd.f32 %v1468_v57, %v255_v1  ;;  %v5265_v56 = vld [vmem:[%s7378_s6 + $0xc] ss:$16 sps:$4 sm:$0xff]   ;;  %v5260_v57 = vld [vmem:[%s7378_s6] ss:$16 sps:$4 sm:$0xff]  }
 0x14f   :  { %v1470_v58 = vpop.f32.mrf.mxu1  ;;  %2337 = vmatprep.mubr.bf16.mxu0 %v5616_v13  ;;  %2306 = vmatpush1.bf16.msra.mxu0 %v5218_v27  ;;  %v5277_v27 = vld [vmem:[%s7379_s8 + $0x4d4] ss:$28 sps:$4 sm:$0xff]  }
 0x150   :  { %2307 = vmatprep.subr.bf16.mxu0 %v5226_v29  ;;  %v5263_v58 = vld [vmem:[%s7378_s6 + $0x8] ss:$16 sps:$4 sm:$0xff]  }
 0x151   :  { %v1471_v59 = vpop.f32.mrf.mxu1  ;;  %v5283_v29 = vld [vmem:[%s7379_s8 + $0x49c] ss:$28 sps:$4 sm:$0xff]  }
 0x152   :  { %v5268_v59 = vld [vmem:[%s7379_s8 + $0x18c] ss:$28 sps:$4 sm:$0xff]  }
 0x153   :  { %2308 = vmatpush1.bf16.msra.mxu0 %v5224_v30  ;;  %v5281_v30 = vld [vmem:[%s7379_s8 + $0x498] ss:$28 sps:$4 sm:$0xff]  }
 0x154   :  { %2309 = vmatprep.subr.bf16.mxu0 %v5232_v31  ;;  %v5289_v31 = vld [vmem:[%s7379_s8 + $0x464] ss:$28 sps:$4 sm:$0xff]  }
 0x157   :  { %2310 = vmatpush1.bf16.msra.mxu0 %v5230_v35  ;;  %v5287_v35 = vld [vmem:[%s7379_s8 + $0x460] ss:$28 sps:$4 sm:$0xff]  }
 0x158   :  { %2311 = vmatprep.subr.bf16.mxu0 %v5238_v38  ;;  %v5295_v38 = vld [vmem:[%s7379_s8 + $0x42c] ss:$28 sps:$4 sm:$0xff]  }
 0x15b   :  { %2312 = vmatpush1.bf16.msra.mxu0 %v5236_v40  ;;  %v5293_v40 = vld [vmem:[%s7379_s8 + $0x428] ss:$28 sps:$4 sm:$0xff]  }
 0x15c   :  { %2313 = vmatprep.subr.bf16.mxu0 %v5244_v42  ;;  %v5301_v42 = vld [vmem:[%s7379_s8 + $0x3f4] ss:$28 sps:$4 sm:$0xff]  }
 0x15f   :  { %2314 = vmatpush1.bf16.msra.mxu0 %v5242_v43  ;;  %v5296_v43 = vld [vmem:[%s7379_s8 + $0x70] ss:$28 sps:$4 sm:$0xff]  }
 0x160   :  { %2315 = vmatprep.subr.bf16.mxu0 %v5250_v46  ;;  %v5307_v46 = vld [vmem:[%s7379_s8 + $0x3bc] ss:$28 sps:$4 sm:$0xff]  }
 0x163   :  { %2316 = vmatpush1.bf16.msra.mxu0 %v5248_v48  ;;  %v5305_v48 = vld [vmem:[%s7379_s8 + $0x3b8] ss:$28 sps:$4 sm:$0xff]  }
 0x164   :  { %2317 = vmatprep.subr.bf16.mxu0 %v5256_v50  ;;  %v5313_v50 = vld [vmem:[%s7379_s8 + $0x384] ss:$28 sps:$4 sm:$0xff]  }
 0x167   :  { %2318 = vmatpush1.bf16.msra.mxu0 %v5254_v53  ;;  %v5311_v53 = vld [vmem:[%s7379_s8 + $0x380] ss:$28 sps:$4 sm:$0xff]  }
 0x168   :  { %2319 = vmatprep.subr.bf16.mxu0 %v5262_v55  ;;  %v5319_v55 = vld [vmem:[%s7379_s8 + $0x6cc] ss:$28 sps:$4 sm:$0xff]  }
 0x16b   :  { %2320 = vmatpush1.bf16.msra.mxu0 %v5260_v57  ;;  %v5317_v57 = vld [vmem:[%s7379_s8 + $0x6c8] ss:$28 sps:$4 sm:$0xff]  }
 0x16c   :  { %3840 = vmatprep.subr.bf16.mxu0 %v5268_v59  ;;  %v5325_v59 = vld [vmem:[%s7379_s8 + $0x694] ss:$28 sps:$4 sm:$0xff]  }
 0x182   :  { %v1507_v62 = vpop.f32.mrf.mxu0 }
 0x183   :  { %v1508_v8 = vadd.f32 %v1507_v62, %v1467_v3  ;;  %v5271_v62 = vld [vmem:[%s7379_s8 + $0x50c] ss:$28 sps:$4 sm:$0xff]   ;;  %v1668_v3 = vld [vmem:[%s7380_s5] sm:$0x3] }
 0x184   :  { %v1509_v0 = vpop.f32.mrf.mxu0 }
 0x185   :  { %v1510_v11 = vadd.f32 %v1509_v0, %v1469_v5  ;;  %v1677_v5 = vrot.slane %v1668_v3, %v6516_v36 }
 0x186   :  { %v1511_v2 = vpop.f32.mrf.mxu0 }
 0x188   :  { %v1512_v4 = vpop.f32.mrf.mxu0 }
 0x189   :  { %v1673_v4 = vrot.slane %v1668_v3, %v6510_v33  ;;  %v5329_v3 = vld [vmem:[%s7379_s8 + $0x658] ss:$28 sps:$4 sm:$0xff]  }
 0x18a   :  { %v1589_v10 = vpop.f32.mrf.mxu0 }
 0x18b   :  { %v1548_v9 = vpop.f32.mrf.mxu1 }
 0x18c   :  { %v1549_v12 = vadd.f32 %v1548_v9, %v1508_v8  ;;  %v1591_v17 = vpop.f32.mrf.mxu0 }
 0x18d   :  { %v1550_v16 = vpop.f32.mrf.mxu1 }
 0x18e   :  { %v1590_v18 = vadd.f32 %v1589_v10, %v1549_v12  ;;  %v1551_v19 = vadd.f32 %v1550_v16, %v1510_v11  ;;  %v1593_v21 = vpop.f32.mrf.mxu0 }
 0x18f   :  { %v1552_v20 = vpop.f32.mrf.mxu1  ;;  %v2087_v21 = vld [vmem:[%s7382_s1] sm:$0xff] }
 0x190   :  { %v1592_v22 = vadd.f32 %v1591_v17, %v1551_v19  ;;  %v1598_v23 = vmax.f32 %v1590_v18, 0.0  ;;  %v1594_v25 = vpop.f32.mrf.mxu0 }
 0x191   :  { %v1553_v24 = vpop.f32.mrf.mxu1  ;;  %v5266_v25 = vld [vmem:[%s7379_s8 + $0x188] ss:$28 sps:$4 sm:$0xff]  }
 0x192   :  { %v1599_v26 = vmax.f32 %v1592_v22, 0.0  ;;  %v1602_v52 = vpack.c.bf16 %v1598_v23, %v1598_v23 }
 0x194   :  { %v1603_v7 = vpack.c.bf16 %v1599_v26, %v1599_v26  ;;  %v5269_v26 = vld [vmem:[%s7379_s8 + $0x508] ss:$28 sps:$4 sm:$0xff]  }
 0x196   :  { %2073 = vmatprep.mubr.bf16.mxu1 %v1603_v7 }
 0x197   :  { %2074 = vmatmul.mubr.bf16.vlgmr.msra.gmra.mxu1 %v1602_v52  ;;  %v5274_v52 = vld [vmem:[%s7379_s8 + $0x154] ss:$28 sps:$4 sm:$0xff]  }
 0x198   :  { %2378 = vmatprep.mubr.bf16.mxu1 %v5616_v13  ;;  %2347 = vmatpush1.bf16.msra.mxu1 %v5221_v14  ;;  %v5227_v13 = vld [vmem:[%s7378_s6 + $0xc8] ss:$16 sps:$4 sm:$0xff]   ;;  %v5275_v14 = vld [vmem:[%s7379_s8 + $0x4d0] ss:$28 sps:$4 sm:$0xff]  }
 0x199   :  { %2348 = vmatprep.subr.bf16.mxu1 %v5229_v6  ;;  %v5278_v6 = vld [vmem:[%s7379_s8 + $0x118] ss:$28 sps:$4 sm:$0xff]  }
 0x19c   :  { %2349 = vmatpush1.bf16.msra.mxu1 %v5227_v13  ;;  %v5286_v13 = vld [vmem:[%s7379_s8 + $0xe4] ss:$28 sps:$4 sm:$0xff]  }
 0x19d   :  { %2350 = vmatprep.subr.bf16.mxu1 %v5235_v32  ;;  %v5284_v32 = vld [vmem:[%s7379_s8 + $0xe0] ss:$28 sps:$4 sm:$0xff]  }
 0x1a0   :  { %2351 = vmatpush1.bf16.msra.mxu1 %v5233_v37  ;;  %v5292_v37 = vld [vmem:[%s7379_s8 + $0xac] ss:$28 sps:$4 sm:$0xff]  }
 0x1a1   :  { %2352 = vmatprep.subr.bf16.mxu1 %v5241_v39  ;;  %v5290_v39 = vld [vmem:[%s7379_s8 + $0xa8] ss:$28 sps:$4 sm:$0xff]  }
 0x1a4   :  { %2353 = vmatpush1.bf16.msra.mxu1 %v5239_v41  ;;  %v5298_v41 = vld [vmem:[%s7379_s8 + $0x74] ss:$28 sps:$4 sm:$0xff]  }
 0x1a5   :  { %2354 = vmatprep.subr.bf16.mxu1 %v5247_v45  ;;  %v5304_v45 = vld [vmem:[%s7379_s8 + $0x3c] ss:$28 sps:$4 sm:$0xff]  }
 0x1a8   :  { %2355 = vmatpush1.bf16.msra.mxu1 %v5245_v44  ;;  %v5299_v44 = vld [vmem:[%s7379_s8 + $0x3f0] ss:$28 sps:$4 sm:$0xff]  }
 0x1a9   :  { %2356 = vmatprep.subr.bf16.mxu1 %v5253_v47  ;;  %v5302_v47 = vld [vmem:[%s7379_s8 + $0x38] ss:$28 sps:$4 sm:$0xff]  }
 0x1ac   :  { %2357 = vmatpush1.bf16.msra.mxu1 %v5251_v49  ;;  %v5310_v49 = vld [vmem:[%s7379_s8 + $0x4] ss:$28 sps:$4 sm:$0xff]  }
 0x1ad   :  { %2358 = vmatprep.subr.bf16.mxu1 %v5259_v51  ;;  %v5308_v51 = vld [vmem:[%s7379_s8] ss:$28 sps:$4 sm:$0xff]  }
 0x1b0   :  { %2359 = vmatpush1.bf16.msra.mxu1 %v5257_v54  ;;  %v5316_v54 = vld [vmem:[%s7379_s8 + $0x34c] ss:$28 sps:$4 sm:$0xff]  }
 0x1b1   :  { %2360 = vmatprep.subr.bf16.mxu1 %v5265_v56  ;;  %v5314_v56 = vld [vmem:[%s7379_s8 + $0x348] ss:$28 sps:$4 sm:$0xff]  }
 0x1b4   :  { %2361 = vmatpush1.bf16.msra.mxu1 %v5263_v58  ;;  %v5322_v58 = vld [vmem:[%s7379_s8 + $0x314] ss:$28 sps:$4 sm:$0xff]  }
 0x1b5   :  { %3881 = vmatprep.subr.bf16.mxu1 %v5271_v62  ;;  %v5320_v62 = vld [vmem:[%s7379_s8 + $0x310] ss:$28 sps:$4 sm:$0xff]  }
 0x20e   :  { %v2034_v63 = vpop.f32.mrf.mxu0 }
 0x20f   :  { %v2035_v8 = vadd.f32 %v2034_v63, %v1673_v4  ;;  %v5323_v63 = vld [vmem:[%s7379_s8 + $0x690] ss:$28 sps:$4 sm:$0xff]   ;;  %v5334_v4 = vld [vmem:[%s7379_s8 + $0x2a4] ss:$28 sps:$4 sm:$0xff]  }
 0x210   :  { %v2036_v0 = vpop.f32.mrf.mxu0 }
 0x211   :  { %v2037_v10 = vadd.f32 %v2036_v0, %v1677_v5  ;;  %v5328_v0 = vld [vmem:[%s7379_s8 + $0x2dc] ss:$28 sps:$4 sm:$0xff]   ;;  %v5337_v5 = vld [vmem:[%s7379_s8 + $0x624] ss:$28 sps:$4 sm:$0xff]  }
 0x212   :  { %v2038_v1 = vpop.f32.mrf.mxu0 }
 0x213   :  { %v5331_v1 = vld [vmem:[%s7379_s8 + $0x65c] ss:$28 sps:$4 sm:$0xff]  }
 0x214   :  { %v2039_v2 = vpop.f32.mrf.mxu0 }
 0x215   :  { %v5326_v2 = vld [vmem:[%s7379_s8 + $0x2d8] ss:$28 sps:$4 sm:$0xff]  }
 0x257   :  { %v2075_v9 = vpop.f32.mrf.mxu1 }
 0x258   :  { %v2076_v11 = vadd.f32 %v2075_v9, %v2035_v8  ;;  %v5332_v8 = vld [vmem:[%s7379_s8 + $0x2a0] ss:$28 sps:$4 sm:$0xff]  }
 0x259   :  { %v2077_v12 = vpop.f32.mrf.mxu1  ;;  %v5335_v9 = vld [vmem:[%s7379_s8 + $0x620] ss:$28 sps:$4 sm:$0xff]  }
 0x25a   :  { %2082 = vst [vmem:[%s7381_s11] sm:$0xff] %v2076_v11  ;;  %v2078_v16 = vadd.f32 %v2077_v12, %v2037_v10  ;;  %v5340_v10 = vld [vmem:[%s7379_s8 + $0x26c] ss:$28 sps:$4 sm:$0xff]  }
 0x25b   :  { %v2079_v17 = vpop.f32.mrf.mxu1  ;;  %v5338_v12 = vld [vmem:[%s7379_s8 + $0x268] ss:$28 sps:$4 sm:$0xff]  }
 0x25c   :  { %2083 = vst [vmem:[%s7381_s11 + $0x8] sm:$0xff] %v2078_v16  ;;  %v2084_v18 = vmul.f32 0.5, %v2078_v16  ;;  %v5341_v16 = vld [vmem:[%s7379_s8 + $0x5e8] ss:$28 sps:$4 sm:$0xff]   ;;  %v5346_v17 = vld [vmem:[%s7379_s8 + $0x234] ss:$28 sps:$4 sm:$0xff]  }
 0x25d   :  { %v2080_v19 = vpop.f32.mrf.mxu1 }
 0x25e   :  { %v2085_v20 = vmul.f32 1.442695, %v2084_v18  ;;  %v5349_v18 = vld [vmem:[%s7379_s8 + $0x5b4] ss:$28 sps:$4 sm:$0xff]  }
 0x25f   :  { %v5344_v19 = vld [vmem:[%s7379_s8 + $0x230] ss:$28 sps:$4 sm:$0xff]  }
 0x260   :  { %5586 = vpow2.f32 %v2085_v20  ;;  %v5347_v20 = vld [vmem:[%s7379_s8 + $0x5b0] ss:$28 sps:$4 sm:$0xff]  }
 0x26d   :  { %v5587_v22 = vpop.eup %5586 }
 0x26e   :  { %v2088_v23 = vmul.f32 %v5587_v22, %v2087_v21  ;;  %v5352_v21 = vld [vmem:[%s7379_s8 + $0x1fc] ss:$28 sps:$4 sm:$0xff]  }
 0x26f   :  { %v5355_v22 = vld [vmem:[%s7379_s8 + $0x57c] ss:$28 sps:$4 sm:$0xff]  }
 0x270   :  { %v2089_v24 = vadd.f32 %v2088_v23, %v2076_v11  ;;  %v5343_v11 = vld [vmem:[%s7379_s8 + $0x5ec] ss:$28 sps:$4 sm:$0xff]   ;;  %v5350_v23 = vld [vmem:[%s7379_s8 + $0x1f8] ss:$28 sps:$4 sm:$0xff]  }
 0x272   :  { %v2090_v7 = vpack.c.bf16 %v2089_v24, %v2089_v24  ;;  %v5353_v24 = vld [vmem:[%s7379_s8 + $0x578] ss:$28 sps:$4 sm:$0xff]  }
 0x274   :  { %2338 = vmatmul.mubr.bf16.vlgmr.msra.gmra.mxu0 %v2090_v7  ;;  %2379 = vmatmul.mubr.bf16.vlgmr.msra.gmra.mxu1 %v2090_v7  ;;  %v5356_v7 = vld [vmem:[%s7379_s8 + $0x1c0] ss:$28 sps:$4 sm:$0xff]  }
 0x275   :  { %3841 = vmatpush1.bf16.msra.mxu0 %v5266_v25  ;;  %3882 = vmatpush1.bf16.msra.mxu1 %v5269_v26  ;;  %v5358_v25 = vld [vmem:[%s7379_s8 + $0x1c4] ss:$28 sps:$4 sm:$0xff]  }
 0x276   :  { %3842 = vmatprep.subr.bf16.mxu0 %v5274_v52  ;;  %3883 = vmatprep.subr.bf16.mxu1 %v5277_v27  ;;  %v5361_v26 = vld [vmem:[%s7379_s8 + $0x544] ss:$28 sps:$4 sm:$0xff]   ;;  %v5364_v27 = vld [vmem:[%s7379_s8 + $0x194] ss:$28 sps:$4 sm:$0xff]  }
 0x277   :  { %v5359_v52 = vld [vmem:[%s7379_s8 + $0x540] ss:$28 sps:$4 sm:$0xff]  }
 0x279   :  { %3843 = vmatpush1.bf16.msra.mxu0 %v5272_v15  ;;  %3884 = vmatpush1.bf16.msra.mxu1 %v5275_v14  ;;  %v5367_v15 = vld [vmem:[%s7379_s8 + $0x514] ss:$28 sps:$4 sm:$0xff]   ;;  %v2123_v14 = vld [vmem:[%s7383_s7] sm:$0xf] }
 0x27a   :  { %3844 = vmatprep.subr.bf16.mxu0 %v5280_v28  ;;  %3885 = vmatprep.subr.bf16.mxu1 %v5283_v29  ;;  %v2128_v28 = vrot.slane %v2123_v14, %v6510_v33  ;;  %v2136_v29 = vrot.slane %v2123_v14, %v6522_v60 }
 0x27d   :  { %3845 = vmatpush1.bf16.msra.mxu0 %v5278_v6  ;;  %3886 = vmatpush1.bf16.msra.mxu1 %v5281_v30  ;;  %v2132_v6 = vrot.slane %v2123_v14, %v6516_v36  ;;  %v2140_v30 = vrot.slane %v2123_v14, %v6525_v61  ;;  %v5418_v14 = vld [vmem:[%s7379_s8 + $0x31c] ss:$28 sps:$4 sm:$0xff]  }
 0x27e   :  { %3846 = vmatprep.subr.bf16.mxu0 %v5286_v13  ;;  %3887 = vmatprep.subr.bf16.mxu1 %v5289_v31 }
 0x281   :  { %3847 = vmatpush1.bf16.msra.mxu0 %v5284_v32  ;;  %3888 = vmatpush1.bf16.msra.mxu1 %v5287_v35 }
 0x282   :  { %3848 = vmatprep.subr.bf16.mxu0 %v5292_v37  ;;  %3889 = vmatprep.subr.bf16.mxu1 %v5295_v38 }
 0x285   :  { %3849 = vmatpush1.bf16.msra.mxu0 %v5290_v39  ;;  %3890 = vmatpush1.bf16.msra.mxu1 %v5293_v40 }
 0x286   :  { %3850 = vmatprep.subr.bf16.mxu0 %v5298_v41  ;;  %3891 = vmatprep.subr.bf16.mxu1 %v5301_v42 }
 0x289   :  { %3851 = vmatpush1.bf16.msra.mxu0 %v5296_v43  ;;  %3892 = vmatpush1.bf16.msra.mxu1 %v5299_v44 }
 0x28a   :  { %3852 = vmatprep.subr.bf16.mxu0 %v5304_v45  ;;  %3893 = vmatprep.subr.bf16.mxu1 %v5307_v46 }
 0x28d   :  { %3853 = vmatpush1.bf16.msra.mxu0 %v5302_v47  ;;  %3894 = vmatpush1.bf16.msra.mxu1 %v5305_v48 }
 0x28e   :  { %3854 = vmatprep.subr.bf16.mxu0 %v5310_v49  ;;  %3895 = vmatprep.subr.bf16.mxu1 %v5313_v50 }
 0x291   :  { %3855 = vmatpush1.bf16.msra.mxu0 %v5308_v51  ;;  %3896 = vmatpush1.bf16.msra.mxu1 %v5311_v53  ;;  %v5362_v51 = vld [vmem:[%s7379_s8 + $0x190] ss:$28 sps:$4 sm:$0xff]  }
 0x292   :  { %3856 = vmatprep.subr.bf16.mxu0 %v5316_v54  ;;  %3897 = vmatprep.subr.bf16.mxu1 %v5319_v55  ;;  %v5365_v53 = vld [vmem:[%s7379_s8 + $0x510] ss:$28 sps:$4 sm:$0xff]  }
 0x295   :  { %3857 = vmatpush2.bf16.msra.mxu0 %v5314_v56  ;;  %3898 = vmatpush2.bf16.msra.mxu1 %v5317_v57  ;;  %v5370_v56 = vld [vmem:[%s7379_s8 + $0x15c] ss:$28 sps:$4 sm:$0xff]  }
 0x296   :  { %3858 = vmatprep.subr.bf16.mxu0 %v5322_v58  ;;  %3899 = vmatprep.subr.bf16.mxu1 %v5325_v59  ;;  %v5373_v57 = vld [vmem:[%s7379_s8 + $0x4dc] ss:$28 sps:$4 sm:$0xff]  }
 0x297   :  { %v5368_v58 = vld [vmem:[%s7379_s8 + $0x158] ss:$28 sps:$4 sm:$0xff]  }
 0x298   :  { %v5371_v59 = vld [vmem:[%s7379_s8 + $0x4d8] ss:$28 sps:$4 sm:$0xff]  }
 0x299   :  { %3859 = vmatpush2.bf16.msra.mxu0 %v5320_v62  ;;  %3900 = vmatpush2.bf16.msra.mxu1 %v5323_v63  ;;  %v5376_v62 = vld [vmem:[%s7379_s8 + $0x124] ss:$28 sps:$4 sm:$0xff]  }
 0x29a   :  { %3860 = vmatprep.subr.bf16.mxu0 %v5328_v0  ;;  %3901 = vmatprep.subr.bf16.mxu1 %v5331_v1  ;;  %v5379_v63 = vld [vmem:[%s7379_s8 + $0x4a4] ss:$28 sps:$4 sm:$0xff]  }
 0x29b   :  { %v5374_v0 = vld [vmem:[%s7379_s8 + $0x120] ss:$28 sps:$4 sm:$0xff]  }
 0x29c   :  { %v5377_v1 = vld [vmem:[%s7379_s8 + $0x4a0] ss:$28 sps:$4 sm:$0xff]  }
 0x29d   :  { %3861 = vmatpush2.bf16.msra.mxu0 %v5326_v2  ;;  %3902 = vmatpush2.bf16.msra.mxu1 %v5329_v3  ;;  %v5382_v2 = vld [vmem:[%s7379_s8 + $0xec] ss:$28 sps:$4 sm:$0xff]  }
 0x29e   :  { %3862 = vmatprep.subr.bf16.mxu0 %v5334_v4  ;;  %3903 = vmatprep.subr.bf16.mxu1 %v5337_v5  ;;  %v5385_v3 = vld [vmem:[%s7379_s8 + $0x46c] ss:$28 sps:$4 sm:$0xff]  }
 0x29f   :  { %v5380_v4 = vld [vmem:[%s7379_s8 + $0xe8] ss:$28 sps:$4 sm:$0xff]  }
 0x2a0   :  { %v5383_v5 = vld [vmem:[%s7379_s8 + $0x468] ss:$28 sps:$4 sm:$0xff]  }
 0x2a1   :  { %3863 = vmatpush2.bf16.msra.mxu0 %v5332_v8  ;;  %3904 = vmatpush2.bf16.msra.mxu1 %v5335_v9  ;;  %v5388_v8 = vld [vmem:[%s7379_s8 + $0xb4] ss:$28 sps:$4 sm:$0xff]  }
 0x2a2   :  { %3864 = vmatprep.subr.bf16.mxu0 %v5340_v10  ;;  %3905 = vmatprep.subr.bf16.mxu1 %v5343_v11  ;;  %v5391_v9 = vld [vmem:[%s7379_s8 + $0x434] ss:$28 sps:$4 sm:$0xff]  }
 0x2a3   :  { %v5386_v10 = vld [vmem:[%s7379_s8 + $0xb0] ss:$28 sps:$4 sm:$0xff]  }
 0x2a4   :  { %v5389_v11 = vld [vmem:[%s7379_s8 + $0x430] ss:$28 sps:$4 sm:$0xff]  }
 0x2a5   :  { %3865 = vmatpush2.bf16.msra.mxu0 %v5338_v12  ;;  %3906 = vmatpush2.bf16.msra.mxu1 %v5341_v16  ;;  %v5394_v12 = vld [vmem:[%s7379_s8 + $0x7c] ss:$28 sps:$4 sm:$0xff]  }
 0x2a6   :  { %3866 = vmatprep.subr.bf16.mxu0 %v5346_v17  ;;  %3907 = vmatprep.subr.bf16.mxu1 %v5349_v18  ;;  %v5397_v16 = vld [vmem:[%s7379_s8 + $0x3fc] ss:$28 sps:$4 sm:$0xff]  }
 0x2a7   :  { %v5392_v17 = vld [vmem:[%s7379_s8 + $0x78] ss:$28 sps:$4 sm:$0xff]  }
 0x2a8   :  { %v5395_v18 = vld [vmem:[%s7379_s8 + $0x3f8] ss:$28 sps:$4 sm:$0xff]  }
 0x2a9   :  { %3867 = vmatpush2.bf16.msra.mxu0 %v5344_v19  ;;  %3908 = vmatpush2.bf16.msra.mxu1 %v5347_v20  ;;  %v5400_v19 = vld [vmem:[%s7379_s8 + $0x44] ss:$28 sps:$4 sm:$0xff]  }
 0x2aa   :  { %3868 = vmatprep.subr.bf16.mxu0 %v5352_v21  ;;  %3909 = vmatprep.subr.bf16.mxu1 %v5355_v22  ;;  %v5403_v20 = vld [vmem:[%s7379_s8 + $0x3c4] ss:$28 sps:$4 sm:$0xff]  }
 0x2ab   :  { %v5398_v21 = vld [vmem:[%s7379_s8 + $0x40] ss:$28 sps:$4 sm:$0xff]  }
 0x2ac   :  { %v5401_v22 = vld [vmem:[%s7379_s8 + $0x3c0] ss:$28 sps:$4 sm:$0xff]  }
 0x2ad   :  { %3869 = vmatpush2.bf16.msra.mxu0 %v5350_v23  ;;  %3910 = vmatpush2.bf16.msra.mxu1 %v5353_v24  ;;  %v5406_v23 = vld [vmem:[%s7379_s8 + $0xc] ss:$28 sps:$4 sm:$0xff]  }
 0x2ae   :  { %3870 = vmatprep.subr.bf16.mxu0 %v5358_v25  ;;  %3911 = vmatprep.subr.bf16.mxu1 %v5361_v26  ;;  %v5409_v24 = vld [vmem:[%s7379_s8 + $0x38c] ss:$28 sps:$4 sm:$0xff]  }
 0x2af   :  { %v5404_v25 = vld [vmem:[%s7379_s8 + $0x8] ss:$28 sps:$4 sm:$0xff]  }
 0x2b0   :  { %v5407_v26 = vld [vmem:[%s7379_s8 + $0x388] ss:$28 sps:$4 sm:$0xff]  }
 0x2b1   :  { %3871 = vmatpush2.bf16.msra.mxu0 %v5356_v7  ;;  %3912 = vmatpush2.bf16.msra.mxu1 %v5359_v52  ;;  %v5412_v7 = vld [vmem:[%s7379_s8 + $0x354] ss:$28 sps:$4 sm:$0xff]  }
 0x2b2   :  { %3922 = vmatprep.subr.bf16.mxu0 %v5364_v27  ;;  %3963 = vmatprep.subr.bf16.mxu1 %v5367_v15  ;;  %v5415_v52 = vld [vmem:[%s7379_s8 + $0x6d4] ss:$28 sps:$4 sm:$0xff]  }
 0x2b3   :  { %v5410_v27 = vld [vmem:[%s7379_s8 + $0x350] ss:$28 sps:$4 sm:$0xff]  }
 0x2b4   :  { %v5413_v15 = vld [vmem:[%s7379_s8 + $0x6d0] ss:$28 sps:$4 sm:$0xff]  }
 0x334   :  { %v2339_v13 = vpop.f32.mrf.mxu0  ;;  %v2380_v31 = vpop.f32.mrf.mxu1 }
 0x335   :  { %v2340_v32 = vadd.f32 %v2339_v13, %v2128_v28  ;;  %v2381_v35 = vadd.f32 %v2380_v31, %v2136_v29  ;;  %v5421_v28 = vld [vmem:[%s7379_s8 + $0x69c] ss:$28 sps:$4 sm:$0xff]   ;;  %v5427_v13 = vld [vmem:[%s7379_s8 + $0x664] ss:$28 sps:$4 sm:$0xff]  }
 0x336   :  { %v2341_v37 = vpop.f32.mrf.mxu0  ;;  %v2382_v38 = vpop.f32.mrf.mxu1  ;;  %v5416_v29 = vld [vmem:[%s7379_s8 + $0x318] ss:$28 sps:$4 sm:$0xff]   ;;  %v5422_v31 = vld [vmem:[%s7379_s8 + $0x2e0] ss:$28 sps:$4 sm:$0xff]  }
 0x337   :  { %v2342_v39 = vadd.f32 %v2341_v37, %v2132_v6  ;;  %v2383_v40 = vadd.f32 %v2382_v38, %v2140_v30  ;;  %v2387_v41 = vmax.f32 %v2340_v32, 0.0  ;;  %v2389_v42 = vmax.f32 %v2381_v35, 0.0  ;;  %v5419_v6 = vld [vmem:[%s7379_s8 + $0x698] ss:$28 sps:$4 sm:$0xff]   ;;  %v5424_v30 = vld [vmem:[%s7379_s8 + $0x2e4] ss:$28 sps:$4 sm:$0xff]  }
 0x338   :  { %v2343_v43 = vpop.f32.mrf.mxu0  ;;  %v2384_v44 = vpop.f32.mrf.mxu1  ;;  %v5425_v32 = vld [vmem:[%s7379_s8 + $0x660] ss:$28 sps:$4 sm:$0xff]   ;;  %v5430_v35 = vld [vmem:[%s7379_s8 + $0x2ac] ss:$28 sps:$4 sm:$0xff]  }
 0x339   :  { %v2388_v45 = vmax.f32 %v2342_v39, 0.0  ;;  %v2390_v46 = vmax.f32 %v2383_v40, 0.0  ;;  %v6855_v54 = vpack.c.bf16 %v2387_v41, %v2387_v41  ;;  %v6857_v55 = vpack.c.bf16 %v2389_v42, %v2389_v42  ;;  %v5433_v37 = vld [vmem:[%s7379_s8 + $0x62c] ss:$28 sps:$4 sm:$0xff]   ;;  %v5436_v40 = vld [vmem:[%s7379_s8 + $0x274] ss:$28 sps:$4 sm:$0xff]  }
 0x33a   :  { %v2344_v47 = vpop.f32.mrf.mxu0  ;;  %v2385_v48 = vpop.f32.mrf.mxu1  ;;  %v5428_v38 = vld [vmem:[%s7379_s8 + $0x2a8] ss:$28 sps:$4 sm:$0xff]   ;;  %v5439_v41 = vld [vmem:[%s7379_s8 + $0x5f4] ss:$28 sps:$4 sm:$0xff]   ;;  %v5442_v44 = vld [vmem:[%s7379_s8 + $0x23c] ss:$28 sps:$4 sm:$0xff]  }
 0x33b   :  { %v6845_v49 = vpack.c.bf16 %v2388_v45, %v2388_v45  ;;  %v6847_v50 = vpack.c.bf16 %v2390_v46, %v2390_v46  ;;  %v5431_v39 = vld [vmem:[%s7379_s8 + $0x628] ss:$28 sps:$4 sm:$0xff]   ;;  %v5434_v42 = vld [vmem:[%s7379_s8 + $0x270] ss:$28 sps:$4 sm:$0xff]   ;;  %v5445_v45 = vld [vmem:[%s7379_s8 + $0x5bc] ss:$28 sps:$4 sm:$0xff]  }
 0x33c   :  { %v5437_v43 = vld [vmem:[%s7379_s8 + $0x5f0] ss:$28 sps:$4 sm:$0xff]   ;;  %v5440_v46 = vld [vmem:[%s7379_s8 + $0x238] ss:$28 sps:$4 sm:$0xff]   ;;  %v5448_v48 = vld [vmem:[%s7379_s8 + $0x204] ss:$28 sps:$4 sm:$0xff]  }
 0x33d   :  { %3872 = vmatprep.mubr.bf16.mxu0 %v6845_v49  ;;  %3913 = vmatprep.mubr.bf16.mxu1 %v6847_v50  ;;  %v5443_v47 = vld [vmem:[%s7379_s8 + $0x5b8] ss:$28 sps:$4 sm:$0xff]  }
 0x33e   :  { %3873 = vmatmul.mubr.bf16.vlgmr.msra.gmra.mxu0 %v6855_v54  ;;  %3914 = vmatmul.mubr.bf16.vlgmr.msra.gmra.mxu1 %v6857_v55 }
 0x33f   :  { %3923 = vmatpush1.bf16.msra.mxu0 %v5362_v51  ;;  %3964 = vmatpush1.bf16.msra.mxu1 %v5365_v53  ;;  %v5451_v51 = vld [vmem:[%s7379_s8 + $0x584] ss:$28 sps:$4 sm:$0xff]  }
 0x340   :  { %3954 = vmatprep.mubr.bf16.mxu0 %v6845_v49  ;;  %3995 = vmatprep.mubr.bf16.mxu1 %v6847_v50  ;;  %v5446_v53 = vld [vmem:[%s7379_s8 + $0x200] ss:$28 sps:$4 sm:$0xff]  }
 0x341   :  { %3924 = vmatprep.subr.bf16.mxu0 %v5370_v56  ;;  %3965 = vmatprep.subr.bf16.mxu1 %v5373_v57  ;;  %v5449_v56 = vld [vmem:[%s7379_s8 + $0x580] ss:$28 sps:$4 sm:$0xff]   ;;  %v5454_v57 = vld [vmem:[%s7379_s8 + $0x1cc] ss:$28 sps:$4 sm:$0xff]  }
 0x343   :  { %3925 = vmatpush1.bf16.msra.mxu0 %v5368_v58  ;;  %3966 = vmatpush1.bf16.msra.mxu1 %v5371_v59  ;;  %v5457_v58 = vld [vmem:[%s7379_s8 + $0x54c] ss:$28 sps:$4 sm:$0xff]  }
 0x344   :  { %3926 = vmatprep.subr.bf16.mxu0 %v5376_v62  ;;  %3967 = vmatprep.subr.bf16.mxu1 %v5379_v63  ;;  %v5452_v59 = vld [vmem:[%s7379_s8 + $0x1c8] ss:$28 sps:$4 sm:$0xff]   ;;  %v5460_v63 = vld [vmem:[%s7379_s8 + $0x19c] ss:$28 sps:$4 sm:$0xff]  }
 0x345   :  { %v5455_v62 = vld [vmem:[%s7379_s8 + $0x548] ss:$28 sps:$4 sm:$0xff]  }
 0x347   :  { %3927 = vmatpush1.bf16.msra.mxu0 %v5374_v0  ;;  %3968 = vmatpush1.bf16.msra.mxu1 %v5377_v1  ;;  %v5463_v0 = vld [vmem:[%s7379_s8 + $0x51c] ss:$28 sps:$4 sm:$0xff]  }
 0x348   :  { %3928 = vmatprep.subr.bf16.mxu0 %v5382_v2  ;;  %3969 = vmatprep.subr.bf16.mxu1 %v5385_v3  ;;  %v5458_v1 = vld [vmem:[%s7379_s8 + $0x198] ss:$28 sps:$4 sm:$0xff]   ;;  %v5466_v3 = vld [vmem:[%s7379_s8 + $0x164] ss:$28 sps:$4 sm:$0xff]  }
 0x349   :  { %v5461_v2 = vld [vmem:[%s7379_s8 + $0x518] ss:$28 sps:$4 sm:$0xff]  }
 0x34b   :  { %3929 = vmatpush1.bf16.msra.mxu0 %v5380_v4  ;;  %3970 = vmatpush1.bf16.msra.mxu1 %v5383_v5  ;;  %v5469_v4 = vld [vmem:[%s7379_s8 + $0x4e4] ss:$28 sps:$4 sm:$0xff]  }
 0x34c   :  { %3930 = vmatprep.subr.bf16.mxu0 %v5388_v8  ;;  %3971 = vmatprep.subr.bf16.mxu1 %v5391_v9  ;;  %v5464_v5 = vld [vmem:[%s7379_s8 + $0x160] ss:$28 sps:$4 sm:$0xff]   ;;  %v5472_v9 = vld [vmem:[%s7379_s8 + $0x12c] ss:$28 sps:$4 sm:$0xff]  }
 0x34d   :  { %v5467_v8 = vld [vmem:[%s7379_s8 + $0x4e0] ss:$28 sps:$4 sm:$0xff]  }
 0x34f   :  { %3931 = vmatpush1.bf16.msra.mxu0 %v5386_v10  ;;  %3972 = vmatpush1.bf16.msra.mxu1 %v5389_v11  ;;  %v5475_v10 = vld [vmem:[%s7379_s8 + $0x4ac] ss:$28 sps:$4 sm:$0xff]  }
 0x350   :  { %3932 = vmatprep.subr.bf16.mxu0 %v5394_v12  ;;  %3973 = vmatprep.subr.bf16.mxu1 %v5397_v16  ;;  %v5470_v11 = vld [vmem:[%s7379_s8 + $0x128] ss:$28 sps:$4 sm:$0xff]   ;;  %v5478_v16 = vld [vmem:[%s7379_s8 + $0xf4] ss:$28 sps:$4 sm:$0xff]  }
 0x351   :  { %v5473_v12 = vld [vmem:[%s7379_s8 + $0x4a8] ss:$28 sps:$4 sm:$0xff]  }
 0x353   :  { %3933 = vmatpush1.bf16.msra.mxu0 %v5392_v17  ;;  %3974 = vmatpush1.bf16.msra.mxu1 %v5395_v18  ;;  %v5481_v17 = vld [vmem:[%s7379_s8 + $0x474] ss:$28 sps:$4 sm:$0xff]  }
 0x354   :  { %3934 = vmatprep.subr.bf16.mxu0 %v5400_v19  ;;  %3975 = vmatprep.subr.bf16.mxu1 %v5403_v20  ;;  %v5476_v18 = vld [vmem:[%s7379_s8 + $0xf0] ss:$28 sps:$4 sm:$0xff]   ;;  %v5484_v20 = vld [vmem:[%s7379_s8 + $0xbc] ss:$28 sps:$4 sm:$0xff]  }
 0x355   :  { %v5479_v19 = vld [vmem:[%s7379_s8 + $0x470] ss:$28 sps:$4 sm:$0xff]  }
 0x357   :  { %3935 = vmatpush1.bf16.msra.mxu0 %v5398_v21  ;;  %3976 = vmatpush1.bf16.msra.mxu1 %v5401_v22  ;;  %v5487_v21 = vld [vmem:[%s7379_s8 + $0x43c] ss:$28 sps:$4 sm:$0xff]  }
 0x358   :  { %3936 = vmatprep.subr.bf16.mxu0 %v5406_v23  ;;  %3977 = vmatprep.subr.bf16.mxu1 %v5409_v24  ;;  %v5482_v22 = vld [vmem:[%s7379_s8 + $0xb8] ss:$28 sps:$4 sm:$0xff]   ;;  %v5490_v24 = vld [vmem:[%s7379_s8 + $0x84] ss:$28 sps:$4 sm:$0xff]  }
 0x359   :  { %v5485_v23 = vld [vmem:[%s7379_s8 + $0x438] ss:$28 sps:$4 sm:$0xff]  }
 0x35b   :  { %3937 = vmatpush1.bf16.msra.mxu0 %v5404_v25  ;;  %3978 = vmatpush1.bf16.msra.mxu1 %v5407_v26  ;;  %v5493_v25 = vld [vmem:[%s7379_s8 + $0x404] ss:$28 sps:$4 sm:$0xff]  }
 0x35c   :  { %3938 = vmatprep.subr.bf16.mxu0 %v5412_v7  ;;  %3979 = vmatprep.subr.bf16.mxu1 %v5415_v52  ;;  %v5488_v26 = vld [vmem:[%s7379_s8 + $0x80] ss:$28 sps:$4 sm:$0xff]   ;;  %v5496_v52 = vld [vmem:[%s7379_s8 + $0x4c] ss:$28 sps:$4 sm:$0xff]  }
 0x35d   :  { %v5491_v7 = vld [vmem:[%s7379_s8 + $0x400] ss:$28 sps:$4 sm:$0xff]  }
 0x35f   :  { %3939 = vmatpush2.bf16.msra.mxu0 %v5410_v27  ;;  %3980 = vmatpush2.bf16.msra.mxu1 %v5413_v15  ;;  %v5499_v27 = vld [vmem:[%s7379_s8 + $0x3cc] ss:$28 sps:$4 sm:$0xff]  }
 0x360   :  { %3940 = vmatprep.subr.bf16.mxu0 %v5418_v14  ;;  %3981 = vmatprep.subr.bf16.mxu1 %v5421_v28  ;;  %v5494_v15 = vld [vmem:[%s7379_s8 + $0x48] ss:$28 sps:$4 sm:$0xff]   ;;  %v5502_v28 = vld [vmem:[%s7379_s8 + $0x14] ss:$28 sps:$4 sm:$0xff]  }
 0x361   :  { %v5497_v14 = vld [vmem:[%s7379_s8 + $0x3c8] ss:$28 sps:$4 sm:$0xff]  }
 0x363   :  { %3941 = vmatpush2.bf16.msra.mxu0 %v5416_v29  ;;  %3982 = vmatpush2.bf16.msra.mxu1 %v5419_v6  ;;  %v5505_v29 = vld [vmem:[%s7379_s8 + $0x394] ss:$28 sps:$4 sm:$0xff]  }
 0x364   :  { %3942 = vmatprep.subr.bf16.mxu0 %v5424_v30  ;;  %3983 = vmatprep.subr.bf16.mxu1 %v5427_v13  ;;  %v5500_v6 = vld [vmem:[%s7379_s8 + $0x10] ss:$28 sps:$4 sm:$0xff]   ;;  %v5508_v13 = vld [vmem:[%s7379_s8 + $0x35c] ss:$28 sps:$4 sm:$0xff]  }
 0x365   :  { %v5503_v30 = vld [vmem:[%s7379_s8 + $0x390] ss:$28 sps:$4 sm:$0xff]  }
 0x367   :  { %3943 = vmatpush2.bf16.msra.mxu0 %v5422_v31  ;;  %3984 = vmatpush2.bf16.msra.mxu1 %v5425_v32  ;;  %v5511_v31 = vld [vmem:[%s7379_s8 + $0x6dc] ss:$28 sps:$4 sm:$0xff]  }
 0x368   :  { %3944 = vmatprep.subr.bf16.mxu0 %v5430_v35  ;;  %3985 = vmatprep.subr.bf16.mxu1 %v5433_v37  ;;  %v5506_v32 = vld [vmem:[%s7379_s8 + $0x358] ss:$28 sps:$4 sm:$0xff]   ;;  %v5514_v37 = vld [vmem:[%s7379_s8 + $0x324] ss:$28 sps:$4 sm:$0xff]  }
 0x369   :  { %v5509_v35 = vld [vmem:[%s7379_s8 + $0x6d8] ss:$28 sps:$4 sm:$0xff]  }
 0x36b   :  { %3945 = vmatpush2.bf16.msra.mxu0 %v5428_v38  ;;  %3986 = vmatpush2.bf16.msra.mxu1 %v5431_v39  ;;  %v5517_v38 = vld [vmem:[%s7379_s8 + $0x6a4] ss:$28 sps:$4 sm:$0xff]  }
 0x36c   :  { %3946 = vmatprep.subr.bf16.mxu0 %v5436_v40  ;;  %3987 = vmatprep.subr.bf16.mxu1 %v5439_v41  ;;  %v5512_v39 = vld [vmem:[%s7379_s8 + $0x320] ss:$28 sps:$4 sm:$0xff]   ;;  %v5520_v41 = vld [vmem:[%s7379_s8 + $0x2ec] ss:$28 sps:$4 sm:$0xff]  }
 0x36d   :  { %v5515_v40 = vld [vmem:[%s7379_s8 + $0x6a0] ss:$28 sps:$4 sm:$0xff]  }
 0x36f   :  { %3947 = vmatpush2.bf16.msra.mxu0 %v5434_v42  ;;  %3988 = vmatpush2.bf16.msra.mxu1 %v5437_v43  ;;  %v5523_v42 = vld [vmem:[%s7379_s8 + $0x66c] ss:$28 sps:$4 sm:$0xff]  }
 0x370   :  { %3948 = vmatprep.subr.bf16.mxu0 %v5442_v44  ;;  %3989 = vmatprep.subr.bf16.mxu1 %v5445_v45  ;;  %v5518_v43 = vld [vmem:[%s7379_s8 + $0x2e8] ss:$28 sps:$4 sm:$0xff]   ;;  %v5526_v45 = vld [vmem:[%s7379_s8 + $0x2b4] ss:$28 sps:$4 sm:$0xff]  }
 0x371   :  { %v5521_v44 = vld [vmem:[%s7379_s8 + $0x668] ss:$28 sps:$4 sm:$0xff]  }
 0x373   :  { %3949 = vmatpush2.bf16.msra.mxu0 %v5440_v46  ;;  %3990 = vmatpush2.bf16.msra.mxu1 %v5443_v47  ;;  %v5529_v46 = vld [vmem:[%s7379_s8 + $0x634] ss:$28 sps:$4 sm:$0xff]  }
 0x374   :  { %3950 = vmatprep.subr.bf16.mxu0 %v5448_v48  ;;  %3991 = vmatprep.subr.bf16.mxu1 %v5451_v51  ;;  %v5524_v47 = vld [vmem:[%s7379_s8 + $0x2b0] ss:$28 sps:$4 sm:$0xff]   ;;  %v5532_v51 = vld [vmem:[%s7379_s8 + $0x27c] ss:$28 sps:$4 sm:$0xff]  }
 0x375   :  { %v5527_v48 = vld [vmem:[%s7379_s8 + $0x630] ss:$28 sps:$4 sm:$0xff]  }
 0x377   :  { %3951 = vmatpush2.bf16.msra.mxu0 %v5446_v53  ;;  %3992 = vmatpush2.bf16.msra.mxu1 %v5449_v56  ;;  %v5535_v53 = vld [vmem:[%s7379_s8 + $0x5fc] ss:$28 sps:$4 sm:$0xff]  }
 0x378   :  { %3952 = vmatprep.subr.bf16.mxu0 %v5454_v57  ;;  %3993 = vmatprep.subr.bf16.mxu1 %v5457_v58  ;;  %v5530_v56 = vld [vmem:[%s7379_s8 + $0x278] ss:$28 sps:$4 sm:$0xff]   ;;  %v5538_v58 = vld [vmem:[%s7379_s8 + $0x244] ss:$28 sps:$4 sm:$0xff]  }
 0x379   :  { %v5533_v57 = vld [vmem:[%s7379_s8 + $0x5f8] ss:$28 sps:$4 sm:$0xff]  }
 0x37b   :  { %3953 = vmatpush2.bf16.msra.mxu0 %v5452_v59  ;;  %3994 = vmatpush2.bf16.msra.mxu1 %v5455_v62  ;;  %v5541_v59 = vld [vmem:[%s7379_s8 + $0x5c4] ss:$28 sps:$4 sm:$0xff]  }
 0x37c   :  { %4004 = vmatprep.subr.bf16.mxu0 %v5460_v63  ;;  %4045 = vmatprep.subr.bf16.mxu1 %v5463_v0  ;;  %v5536_v62 = vld [vmem:[%s7379_s8 + $0x240] ss:$28 sps:$4 sm:$0xff]   ;;  %v5544_v0 = vld [vmem:[%s7379_s8 + $0x20c] ss:$28 sps:$4 sm:$0xff]  }
 0x37d   :  { %v5539_v63 = vld [vmem:[%s7379_s8 + $0x5c0] ss:$28 sps:$4 sm:$0xff]  }
 0x37e   :  { %3955 = vmatmul.mubr.bf16.vlgmr.msra.gmra.mxu0 %v6855_v54  ;;  %3996 = vmatmul.mubr.bf16.vlgmr.msra.gmra.mxu1 %v6857_v55 }
 0x37f   :  { %4005 = vmatpush1.bf16.msra.mxu0 %v5458_v1  ;;  %4036 = vmatprep.mubr.bf16.mxu0 %v6845_v49  ;;  %v5547_v1 = vld [vmem:[%s7379_s8 + $0x58c] ss:$28 sps:$4 sm:$0xff]  }
 0x380   :  { %4046 = vmatpush1.bf16.msra.mxu1 %v5461_v2  ;;  %4077 = vmatprep.mubr.bf16.mxu1 %v6847_v50  ;;  %v5542_v2 = vld [vmem:[%s7379_s8 + $0x208] ss:$28 sps:$4 sm:$0xff]  }
 0x381   :  { %4006 = vmatprep.subr.bf16.mxu0 %v5466_v3  ;;  %4047 = vmatprep.subr.bf16.mxu1 %v5469_v4  ;;  %v5545_v3 = vld [vmem:[%s7379_s8 + $0x588] ss:$28 sps:$4 sm:$0xff]   ;;  %v5550_v4 = vld [vmem:[%s7379_s8 + $0x1d4] ss:$28 sps:$4 sm:$0xff]  }
 0x383   :  { %4007 = vmatpush1.bf16.msra.mxu0 %v5464_v5  ;;  %v5553_v5 = vld [vmem:[%s7379_s8 + $0x554] ss:$28 sps:$4 sm:$0xff]  }
 0x384   :  { %4048 = vmatpush1.bf16.msra.mxu1 %v5467_v8  ;;  %4008 = vmatprep.subr.bf16.mxu0 %v5472_v9  ;;  %v5548_v8 = vld [vmem:[%s7379_s8 + $0x1d0] ss:$28 sps:$4 sm:$0xff]  }
 0x385   :  { %4049 = vmatprep.subr.bf16.mxu1 %v5475_v10  ;;  %v5551_v9 = vld [vmem:[%s7379_s8 + $0x550] ss:$28 sps:$4 sm:$0xff]   ;;  %v5554_v10 = vld [vmem:[%s7379_s8 + $0x360] ss:$28 sps:$4 sm:$0xff]  }
 0x387   :  { %4009 = vmatpush1.bf16.msra.mxu0 %v5470_v11  ;;  %v5555_v11 = vld [vmem:[%s7379_s8 + $0x6e0] ss:$28 sps:$4 sm:$0xff]  }
 0x388   :  { %4050 = vmatpush1.bf16.msra.mxu1 %v5473_v12  ;;  %4010 = vmatprep.subr.bf16.mxu0 %v5478_v16  ;;  %v5556_v12 = vld [vmem:[%s7379_s8 + $0x1a0] ss:$28 sps:$4 sm:$0xff]  }
 0x389   :  { %4051 = vmatprep.subr.bf16.mxu1 %v5481_v17  ;;  %v5557_v16 = vld [vmem:[%s7379_s8 + $0x520] ss:$28 sps:$4 sm:$0xff]   ;;  %v5558_v17 = vld [vmem:[%s7379_s8 + $0x328] ss:$28 sps:$4 sm:$0xff]  }
 0x38b   :  { %4011 = vmatpush1.bf16.msra.mxu0 %v5476_v18  ;;  %v5559_v18 = vld [vmem:[%s7379_s8 + $0x6a8] ss:$28 sps:$4 sm:$0xff]  }
 0x38c   :  { %4052 = vmatpush1.bf16.msra.mxu1 %v5479_v19  ;;  %4012 = vmatprep.subr.bf16.mxu0 %v5484_v20  ;;  %v5560_v19 = vld [vmem:[%s7379_s8 + $0x168] ss:$28 sps:$4 sm:$0xff]  }
 0x38d   :  { %4053 = vmatprep.subr.bf16.mxu1 %v5487_v21  ;;  %v5561_v20 = vld [vmem:[%s7379_s8 + $0x4e8] ss:$28 sps:$4 sm:$0xff]   ;;  %v5562_v21 = vld [vmem:[%s7379_s8 + $0x2f0] ss:$28 sps:$4 sm:$0xff]  }
 0x38f   :  { %4013 = vmatpush1.bf16.msra.mxu0 %v5482_v22  ;;  %v5563_v22 = vld [vmem:[%s7379_s8 + $0x670] ss:$28 sps:$4 sm:$0xff]  }
 0x390   :  { %4054 = vmatpush1.bf16.msra.mxu1 %v5485_v23  ;;  %4014 = vmatprep.subr.bf16.mxu0 %v5490_v24  ;;  %v5565_v23 = vld [vmem:[%s7379_s8 + $0x4b0] ss:$28 sps:$4 sm:$0xff]   ;;  %v5567_v24 = vld [vmem:[%s7379_s8 + $0x638] ss:$28 sps:$4 sm:$0xff]  }
 0x391   :  { %4055 = vmatprep.subr.bf16.mxu1 %v5493_v25  ;;  %v5568_v25 = vld [vmem:[%s7379_s8 + $0xf8] ss:$28 sps:$4 sm:$0xff]  }
 0x393   :  { %4015 = vmatpush1.bf16.msra.mxu0 %v5488_v26  ;;  %v5569_v26 = vld [vmem:[%s7379_s8 + $0x478] ss:$28 sps:$4 sm:$0xff]  }
 0x394   :  { %4056 = vmatpush1.bf16.msra.mxu1 %v5491_v7  ;;  %4016 = vmatprep.subr.bf16.mxu0 %v5496_v52  ;;  %v5570_v7 = vld [vmem:[%s7379_s8 + $0x280] ss:$28 sps:$4 sm:$0xff]  }
 0x395   :  { %4057 = vmatprep.subr.bf16.mxu1 %v5499_v27  ;;  %v5571_v52 = vld [vmem:[%s7379_s8 + $0x600] ss:$28 sps:$4 sm:$0xff]  }
 0x396   :  { %v5572_v27 = vld [vmem:[%s7379_s8 + $0xc0] ss:$28 sps:$4 sm:$0xff]  }
 0x397   :  { %4017 = vmatpush1.bf16.msra.mxu0 %v5494_v15  ;;  %v5573_v15 = vld [vmem:[%s7379_s8 + $0x440] ss:$28 sps:$4 sm:$0xff]  }
 0x398   :  { %4058 = vmatpush1.bf16.msra.mxu1 %v5497_v14  ;;  %4018 = vmatprep.subr.bf16.mxu0 %v5502_v28  ;;  %v5574_v14 = vld [vmem:[%s7379_s8 + $0x248] ss:$28 sps:$4 sm:$0xff]  }
 0x399   :  { %4059 = vmatprep.subr.bf16.mxu1 %v5505_v29  ;;  %v5575_v28 = vld [vmem:[%s7379_s8 + $0x5c8] ss:$28 sps:$4 sm:$0xff]  }
 0x39a   :  { %v5576_v29 = vld [vmem:[%s7379_s8 + $0x88] ss:$28 sps:$4 sm:$0xff]  }
 0x39b   :  { %4019 = vmatpush1.bf16.msra.mxu0 %v5500_v6  ;;  %v5577_v6 = vld [vmem:[%s7379_s8 + $0x408] ss:$28 sps:$4 sm:$0xff]  }
 0x39c   :  { %4060 = vmatpush1.bf16.msra.mxu1 %v5503_v30  ;;  %4020 = vmatprep.subr.bf16.mxu0 %v5508_v13  ;;  %v5578_v30 = vld [vmem:[%s7379_s8 + $0x210] ss:$28 sps:$4 sm:$0xff]  }
 0x39d   :  { %4061 = vmatprep.subr.bf16.mxu1 %v5511_v31  ;;  %v5579_v13 = vld [vmem:[%s7379_s8 + $0x590] ss:$28 sps:$4 sm:$0xff]  }
 0x39e   :  { %v5580_v31 = vld [vmem:[%s7379_s8 + $0x50] ss:$28 sps:$4 sm:$0xff]  }
 0x39f   :  { %4021 = vmatpush2.bf16.msra.mxu0 %v5506_v32  ;;  %v5581_v32 = vld [vmem:[%s7379_s8 + $0x3d0] ss:$28 sps:$4 sm:$0xff]  }
 0x3a0   :  { %4062 = vmatpush2.bf16.msra.mxu1 %v5509_v35  ;;  %4022 = vmatprep.subr.bf16.mxu0 %v5514_v37  ;;  %v5582_v35 = vld [vmem:[%s7379_s8 + $0x1d8] ss:$28 sps:$4 sm:$0xff]  }
 0x3a1   :  { %4063 = vmatprep.subr.bf16.mxu1 %v5517_v38  ;;  %v5583_v37 = vld [vmem:[%s7379_s8 + $0x558] ss:$28 sps:$4 sm:$0xff]  }
 0x3a2   :  { %v5584_v38 = vld [vmem:[%s7379_s8 + $0x18] ss:$28 sps:$4 sm:$0xff]  }
 0x3a3   :  { %4023 = vmatpush2.bf16.msra.mxu0 %v5512_v39  ;;  %v5585_v39 = vld [vmem:[%s7379_s8 + $0x398] ss:$28 sps:$4 sm:$0xff]  }
 0x3a4   :  { %4064 = vmatpush2.bf16.msra.mxu1 %v5515_v40  ;;  %4024 = vmatprep.subr.bf16.mxu0 %v5520_v41  ;;  %v7346_v40 = vld [vmem:[%s7384_s9] sm:$0x7f] }
 0x3a5   :  { %4065 = vmatprep.subr.bf16.mxu1 %v5523_v42  ;;  %v2656_v41 = vrot.slane %v7346_v40, %v6510_v33  ;;  %v2660_v42 = vrot.slane %v7346_v40, %v6516_v36 }
 0x3a7   :  { %4025 = vmatpush2.bf16.msra.mxu0 %v5518_v43 }
 0x3a8   :  { %4066 = vmatpush2.bf16.msra.mxu1 %v5521_v44  ;;  %4026 = vmatprep.subr.bf16.mxu0 %v5526_v45 }
 0x3a9   :  { %4067 = vmatprep.subr.bf16.mxu1 %v5529_v46 }
 0x3ab   :  { %4027 = vmatpush2.bf16.msra.mxu0 %v5524_v47 }
 0x3ac   :  { %4068 = vmatpush2.bf16.msra.mxu1 %v5527_v48  ;;  %4028 = vmatprep.subr.bf16.mxu0 %v5532_v51 }
 0x3ad   :  { %4069 = vmatprep.subr.bf16.mxu1 %v5535_v53 }
 0x3af   :  { %4029 = vmatpush2.bf16.msra.mxu0 %v5530_v56 }
 0x3b0   :  { %4070 = vmatpush2.bf16.msra.mxu1 %v5533_v57  ;;  %4030 = vmatprep.subr.bf16.mxu0 %v5538_v58 }
 0x3b1   :  { %4071 = vmatprep.subr.bf16.mxu1 %v5541_v59 }
 0x3b3   :  { %4031 = vmatpush2.bf16.msra.mxu0 %v5536_v62 }
 0x3b4   :  { %4072 = vmatpush2.bf16.msra.mxu1 %v5539_v63  ;;  %4032 = vmatprep.subr.bf16.mxu0 %v5544_v0 }
 0x3b5   :  { %4073 = vmatprep.subr.bf16.mxu1 %v5547_v1 }
 0x3b7   :  { %4033 = vmatpush2.bf16.msra.mxu0 %v5542_v2 }
 0x3b8   :  { %4074 = vmatpush2.bf16.msra.mxu1 %v5545_v3  ;;  %4034 = vmatprep.subr.bf16.mxu0 %v5550_v4 }
 0x3b9   :  { %4075 = vmatprep.subr.bf16.mxu1 %v5553_v5  ;;  %v2664_v5 = vrot.slane %v7346_v40, %v6522_v60 }
 0x3bb   :  { %4035 = vmatpush2.bf16.msra.mxu0 %v5548_v8  ;;  %v2668_v8 = vrot.slane %v7346_v40, %v6525_v61 }
 0x3bc   :  { %4076 = vmatpush2.bf16.msra.mxu1 %v5551_v9  ;;  %4776 = vmatprep.subr.bf16.mxu0 %v5554_v10 }
 0x3bd   :  { %4798 = vmatprep.subr.bf16.mxu1 %v5555_v11 }
 0x3be   :  { %4037 = vmatmul.mubr.bf16.vlgmr.msra.gmra.mxu0 %v6855_v54 }
 0x3bf   :  { %4078 = vmatmul.mubr.bf16.vlgmr.msra.gmra.mxu1 %v6857_v55  ;;  %4777 = vmatpush3.bf16.msra.mxu0 %v5556_v12 }
 0x3c0   :  { %4118 = vmatprep.mubr.bf16.mxu0 %v6845_v49  ;;  %4799 = vmatpush3.bf16.msra.mxu1 %v5557_v16  ;;  %v5564_v49 = vld [vmem:[%s7379_s8 + $0x130] ss:$28 sps:$4 sm:$0xff]  }
 0x3c1   :  { %4158 = vmatprep.mubr.bf16.mxu1 %v6847_v50  ;;  %4778 = vmatprep.subr.bf16.mxu0 %v5558_v17  ;;  %v5566_v50 = vld [vmem:[%s7379_s8 + $0x2b8] ss:$28 sps:$4 sm:$0xff]  }
 0x3c2   :  { %4800 = vmatprep.subr.bf16.mxu1 %v5559_v18 }
 0x3c3   :  { %4779 = vmatpush3.bf16.msra.mxu0 %v5560_v19 }
 0x3c4   :  { %4801 = vmatpush3.bf16.msra.mxu1 %v5561_v20  ;;  %4780 = vmatprep.subr.bf16.mxu0 %v5562_v21 }
 0x3c5   :  { %4802 = vmatprep.subr.bf16.mxu1 %v5563_v22 }
 0x3c7   :  { %4781 = vmatpush3.bf16.msra.mxu0 %v5564_v49 }
 0x3c8   :  { %4803 = vmatpush3.bf16.msra.mxu1 %v5565_v23  ;;  %4782 = vmatprep.subr.bf16.mxu0 %v5566_v50 }
 0x3c9   :  { %4804 = vmatprep.subr.bf16.mxu1 %v5567_v24 }
 0x3cb   :  { %4783 = vmatpush3.bf16.msra.mxu0 %v5568_v25 }
 0x3cc   :  { %4805 = vmatpush3.bf16.msra.mxu1 %v5569_v26  ;;  %4784 = vmatprep.subr.bf16.mxu0 %v5570_v7 }
 0x3cd   :  { %4806 = vmatprep.subr.bf16.mxu1 %v5571_v52 }
 0x3cf   :  { %4785 = vmatpush3.bf16.msra.mxu0 %v5572_v27 }
 0x3d0   :  { %4807 = vmatpush3.bf16.msra.mxu1 %v5573_v15  ;;  %4786 = vmatprep.subr.bf16.mxu0 %v5574_v14  ;;  %v2671_v14 = vsub.s32 4, %v6507_v34 }
 0x3d1   :  { %4808 = vmatprep.subr.bf16.mxu1 %v5575_v28  ;;  %v2675_v28 = vsub.s32 5, %v6507_v34 }
 0x3d3   :  { %4787 = vmatpush3.bf16.msra.mxu0 %v5576_v29  ;;  %v2672_v29 = vrot.slane %v7346_v40, %v2671_v14 }
 0x3d4   :  { %4809 = vmatpush3.bf16.msra.mxu1 %v5577_v6  ;;  %4788 = vmatprep.subr.bf16.mxu0 %v5578_v30  ;;  %v2676_v6 = vrot.slane %v7346_v40, %v2675_v28 }
 0x3d5   :  { %4810 = vmatprep.subr.bf16.mxu1 %v5579_v13 }
 0x3d7   :  { %4789 = vmatpush3.bf16.msra.mxu0 %v5580_v31 }
 0x3d8   :  { %4811 = vmatpush3.bf16.msra.mxu1 %v5581_v32  ;;  %4790 = vmatprep.subr.bf16.mxu0 %v5582_v35 }
 0x3d9   :  { %4812 = vmatprep.subr.bf16.mxu1 %v5583_v37 }
 0x3db   :  { %4791 = vmatpush3.bf16.msra.mxu0 %v5584_v38 }
 0x3dc   :  { %4813 = vmatpush3.bf16.msra.mxu1 %v5585_v39 }
 0x3de   :  { %4119 = vmatmul.mubr.bf16.vlgmr.msra.gmra.mxu0 %v6855_v54 }
 0x3df   :  { %4159 = vmatmul.mubr.bf16.vlgmr.msra.gmra.mxu1 %v6857_v55 }
 0x3fe   :  { %v3874_v43 = vpop.f32.mrf.mxu0  ;;  %v3915_v44 = vpop.f32.mrf.mxu1 }
 0x3ff   :  { %v3875_v45 = vadd.f32 %v3874_v43, %v2656_v41 }
 0x400   :  { %v3876_v46 = vpop.f32.mrf.mxu0  ;;  %v3917_v47 = vpop.f32.mrf.mxu1 }
 0x401   :  { %v3916_v48 = vadd.f32 %v3915_v44, %v3875_v45  ;;  %v3877_v54 = vadd.f32 %v3876_v46, %v2660_v42 }
 0x402   :  { %v3878_v51 = vpop.f32.mrf.mxu0  ;;  %v3919_v55 = vpop.f32.mrf.mxu1 }
 0x403   :  { %v4166_v53 = vsub.f32 0.0, %v3916_v48  ;;  %v3918_v56 = vadd.f32 %v3917_v47, %v3877_v54 }
 0x404   :  { %v3879_v57 = vpop.f32.mrf.mxu0  ;;  %v3920_v58 = vpop.f32.mrf.mxu1 }
 0x405   :  { %v4173_v59 = vmul.f32 1.442695, %v4166_v53  ;;  %v4167_v62 = vsub.f32 0.0, %v3918_v56  ;;  %v2679_v56 = vsub.s32 6, %v6507_v34 }
 0x407   :  { %5588 = vpow2.f32 %v4173_v59  ;;  %v4175_v33 = vmul.f32 1.442695, %v4167_v62  ;;  %v2680_v59 = vrot.slane %v7346_v40, %v2679_v56 }
 0x409   :  { %5590 = vpow2.f32 %v4175_v33 }
 0x414   :  { %v5589_v63 = vpop.eup %5588 }
 0x415   :  { %v4187_v36 = vadd.f32 1.0, %v5589_v63 }
 0x416   :  { %v5591_v0 = vpop.eup %5590 }
 0x417   :  { %v4188_v1 = vadd.f32 1.0, %v5591_v0  ;;  %5592 = vrcp.f32 %v4187_v36 }
 0x419   :  { %5594 = vrcp.f32 %v4188_v1 }
 0x424   :  { %v5593_v2 = vpop.eup %5592 }
 0x426   :  { %v5595_v3 = vpop.eup %5594 }
 0x427   :  { %v4772_v4 = vpack.c.bf16 %v5595_v3, %v5593_v2 }
 0x429   :  { %4230 = vst [vmem:[%s7385_s10] sm:$0xff] %v4772_v4 }
 0x43e   :  { %v3956_v9 = vpop.f32.mrf.mxu0  ;;  %v3997_v10 = vpop.f32.mrf.mxu1 }
 0x43f   :  { %v3957_v11 = vadd.f32 %v3956_v9, %v2664_v5 }
 0x440   :  { %v3958_v12 = vpop.f32.mrf.mxu0  ;;  %v3999_v16 = vpop.f32.mrf.mxu1 }
 0x441   :  { %v3998_v17 = vadd.f32 %v3997_v10, %v3957_v11  ;;  %v3959_v18 = vadd.f32 %v3958_v12, %v2668_v8 }
 0x442   :  { %v3960_v19 = vpop.f32.mrf.mxu0  ;;  %v4001_v20 = vpop.f32.mrf.mxu1 }
 0x443   :  { %v4168_v21 = vsub.f32 0.0, %v3998_v17  ;;  %v4000_v22 = vadd.f32 %v3999_v16, %v3959_v18 }
 0x444   :  { %v3961_v49 = vpop.f32.mrf.mxu0  ;;  %v4002_v23 = vpop.f32.mrf.mxu1 }
 0x445   :  { %v4177_v50 = vmul.f32 1.442695, %v4168_v21  ;;  %v4169_v24 = vsub.f32 0.0, %v4000_v22 }
 0x447   :  { %5596 = vpow2.f32 %v4177_v50  ;;  %v4179_v60 = vmul.f32 1.442695, %v4169_v24 }
 0x449   :  { %5598 = vpow2.f32 %v4179_v60 }
 0x454   :  { %v5597_v25 = vpop.eup %5596 }
 0x455   :  { %v4189_v61 = vadd.f32 1.0, %v5597_v25 }
 0x456   :  { %v5599_v26 = vpop.eup %5598 }
 0x457   :  { %v4190_v7 = vadd.f32 1.0, %v5599_v26  ;;  %5600 = vrcp.f32 %v4189_v61 }
 0x459   :  { %5602 = vrcp.f32 %v4190_v7 }
 0x464   :  { %v5601_v52 = vpop.eup %5600 }
 0x466   :  { %v5603_v27 = vpop.eup %5602 }
 0x467   :  { %v4773_v15 = vpack.c.bf16 %v5603_v27, %v5601_v52 }
 0x469   :  { %4231 = vst [vmem:[%s7385_s10 + $0x8] sm:$0xff] %v4773_v15 }
 0x47e   :  { %v4038_v30 = vpop.f32.mrf.mxu0 }
 0x47f   :  { %v4039_v13 = vadd.f32 %v4038_v30, %v2672_v29  ;;  %v4079_v31 = vpop.f32.mrf.mxu1 }
 0x480   :  { %v4040_v32 = vpop.f32.mrf.mxu0 }
 0x481   :  { %v4080_v35 = vadd.f32 %v4079_v31, %v4039_v13  ;;  %v4041_v37 = vadd.f32 %v4040_v32, %v2676_v6  ;;  %v4081_v38 = vpop.f32.mrf.mxu1 }
 0x482   :  { %v4042_v39 = vpop.f32.mrf.mxu0 }
 0x483   :  { %v4170_v41 = vsub.f32 0.0, %v4080_v35  ;;  %v4082_v42 = vadd.f32 %v4081_v38, %v4041_v37  ;;  %v4083_v43 = vpop.f32.mrf.mxu1 }
 0x484   :  { %v4043_v44 = vpop.f32.mrf.mxu0 }
 0x485   :  { %v4181_v45 = vmul.f32 1.442695, %v4170_v41  ;;  %v4171_v46 = vsub.f32 0.0, %v4082_v42  ;;  %v4084_v47 = vpop.f32.mrf.mxu1 }
 0x487   :  { %5604 = vpow2.f32 %v4181_v45  ;;  %v4183_v48 = vmul.f32 1.442695, %v4171_v46 }
 0x489   :  { %5606 = vpow2.f32 %v4183_v48 }
 0x494   :  { %v5605_v54 = vpop.eup %5604 }
 0x495   :  { %v4191_v51 = vadd.f32 1.0, %v5605_v54 }
 0x496   :  { %v5607_v55 = vpop.eup %5606 }
 0x497   :  { %v4192_v53 = vadd.f32 1.0, %v5607_v55  ;;  %5608 = vrcp.f32 %v4191_v51 }
 0x499   :  { %5610 = vrcp.f32 %v4192_v53 }
 0x49e   :  { %v4792_v57 = vpop.f32.mrf.mxu0 }
 0x49f   :  { %v4814_v58 = vpop.f32.mrf.mxu1 }
 0x4a0   :  { %v4793_v62 = vpop.f32.mrf.mxu0 }
 0x4a1   :  { %v4794_v33 = vadd.f32 %v4793_v62, %v4792_v57  ;;  %v4815_v63 = vpop.f32.mrf.mxu1 }
 0x4a2   :  { %v4795_v36 = vpop.f32.mrf.mxu0  ;;  %v4816_v1 = vadd.f32 %v4815_v63, %v4814_v58 }
 0x4a3   :  { %v4121_v0 = vadd.f32 %v4794_v33, %v2680_v59  ;;  %v4817_v2 = vpop.f32.mrf.mxu1 }
 0x4a4   :  { %v4796_v3 = vpop.f32.mrf.mxu0  ;;  %v5609_v4 = vpop.eup %5608 }
 0x4a5   :  { %v4161_v5 = vadd.f32 %v4816_v1, %v4121_v0  ;;  %v4818_v8 = vpop.f32.mrf.mxu1 }
 0x4a6   :  { %v5611_v9 = vpop.eup %5610 }
 0x4a7   :  { %v4774_v10 = vpack.c.bf16 %v5611_v9, %v5609_v4  ;;  %v4172_v11 = vsub.f32 0.0, %v4161_v5 }
 0x4a9   :  { %v4185_v12 = vmul.f32 1.442695, %v4172_v11  ;;  %4232 = vst [vmem:[%s7385_s10 + $0x10] sm:$0xff] %v4774_v10 }
 0x4ab   :  { %5612 = vpow2.f32 %v4185_v12 }
 0x4b8   :  { %v5613_v34 = vpop.eup %5612 }
 0x4b9   :  { %v4193_v40 = vadd.f32 1.0, %v5613_v34 }
 0x4bb   :  { %5614 = vrcp.f32 %v4193_v40 }
 0x4c8   :  { %v5615_v16 = vpop.eup %5614 }
 0x4c9   :  { %v4775_v17 = vpack.c.bf16 %v5615_v16, %v5615_v16 }
 0x4cb   :  { %4234 = vst.msk [vmem:[%s7385_s10 + $0x18] sm:$0xf] %vm4233_vm1, %v4775_v17 }

</bundles_post_ra>
